<compile_context>
chip_gen: v5e
topology: v5e:2x2
jax: 0.10.0
libtpu: 0.0.40
codegen_flags: <defaults>
</compile_context>

<pallas_src>
import numpy as np

import jax
import jax.numpy as jnp
from jax.experimental import pallas as pl
from jax.experimental.pallas import tpu as pltpu

NDF = 8              # ndf (module-level global in the original script)
LRELU_SLOPE = 0.2
BN_EPS = 1e-5
K, STRIDE, PAD = 4, 2, 1


# ---------------------- static (build-time) constants -----------------------

def _out_dim(d):
    return (d + 2 * PAD - K) // STRIDE + 1


def _conv_matrix(w, w_in):
    """PyTorch (OC, C, K, K) conv weight -> Toeplitz matmul operand.

    Returns (K * w_in * C, ow * OC):
      LHS lane (row here) = kh * (w_in*C) + jin*C + c   (tap row, input col, in-chan)
      RHS lane            = jout * OC + oc              (output col, out-chan)
    Horizontal zero-padding taps are simply absent (zero entries); vertical padding is
    handled by the zeroed rows of the activation scratch buffers.
    """
    w = np.asarray(w, np.float32)
    oc_n, c_n, kk, _ = w.shape
    ow = _out_dim(w_in)
    mat = np.zeros((kk * w_in * c_n, ow * oc_n), np.float32)
    for kh in range(kk):
        for jin in range(w_in):
            for jout in range(ow):
                kw = jin - STRIDE * jout + PAD
                if 0 <= kw < kk:
                    r0 = kh * w_in * c_n + jin * c_n
                    mat[r0:r0 + c_n, jout * oc_n:(jout + 1) * oc_n] = w[:, :, kh, kw].T
    return mat


def _bn_group_matrix(ow, oc_n):
    """0/1 matrix (ow*OC, OC) summing the ow column groups of a (w,C)-interleaved row."""
    s = np.zeros((ow * oc_n, oc_n), np.float32)
    for j in range(ow):
        s[j * oc_n:(j + 1) * oc_n, :] = np.eye(oc_n, dtype=np.float32)
    return s


# ------------------------------- builder ------------------------------------

def build_mdiscriminator(params, x_shape):
    """Precompute static operands and return a jitted, fully-fused forward(x)."""
    w1, w2, w3, w4 = params
    n, c_in, h, w = x_shape
    assert c_in == 1 and h == 16 and w == 16, (n, c_in, h, w)

    # (h_in, w_in, C_in, OC, has_batchnorm) per conv layer
    layers = [
        (16, 16, 1,       NDF,     False),
        (8,  8,  NDF,     NDF * 2, True),
        (4,  4,  NDF * 2, NDF * 4, True),
        (2,  2,  NDF * 4, 1,       False),
    ]

    w_mats = tuple(jnp.asarray(_conv_matrix(wt, lay[1]))
                   for wt, lay in zip((w1, w2, w3, w4), layers))
    s2_np = _bn_group_matrix(_out_dim(8), NDF * 2)
    s3_np = _bn_group_matrix(_out_dim(4), NDF * 4)
    s2, s2t = jnp.asarray(s2_np), jnp.asarray(np.ascontiguousarray(s2_np.T))
    s3, s3t = jnp.asarray(s3_np), jnp.asarray(np.ascontiguousarray(s3_np.T))
    kernel_consts = w_mats + (s2, s2t, s3, s3t)

    # Padded activation scratch buffers: (n*(h+2), w*C) per layer, f32.
    scratch = [pltpu.VMEM((n * (hh + 2 * PAD), ww * cc), jnp.float32)
               for (hh, ww, cc, _, _) in layers]

    # ------------------------------ fused kernel -----------------------------

    def kernel(x_ref, w1_ref, w2_ref, w3_ref, w4_ref,
               s2_ref, s2t_ref, s3_ref, s3t_ref,
               o_ref, a1_ref, a2_ref, a3_ref, a4_ref):
        f32 = jnp.float32

        def lrelu(y):
            return jnp.where(y >= 0, y, LRELU_SLOPE * y)

        def conv_image(src_ref, w_val, nn, h_in):
            """Conv2d(k=4, s=2, p=1, bias=False) for one image.

            4 strided sublane reads (one per kernel tap-row) from the zero-padded
            activation buffer, lane-concatenated into an (oh, 4*w*C) patch tile and
            contracted with the Toeplitz weight in a single MXU matmul.
            """
            hp = h_in + 2 * PAD
            oh = _out_dim(h_in)
            taps = []
            for kh in range(K):
                start = nn * hp + kh
                if oh > 1:
                    taps.append(src_ref[pl.ds(start, oh, stride=STRIDE), :])
                else:
                    taps.append(src_ref[pl.ds(start, 1), :])
            patch = jnp.concatenate(taps, axis=1)                 # (oh, 4*w*C)
            return jnp.dot(patch, w_val, preferred_element_type=f32)  # (oh, ow*OC)

        def store_rows(dst_ref, nn, h_out, val):
            # Write one image's (h_out, w_out*OC) rows into the padded buffer interior.
            dst_ref[pl.ds(nn * (h_out + 2 * PAD) + PAD, h_out), :] = val

        def batchnorm(ys, grp_ref, grp_t_ref, count):
            # Training-mode BatchNorm2d (gamma=1, beta=0, biased variance), one-pass
            # stats: per-channel sum & sum-of-squares over (n, h, w).
            # TODO(synk): running_mean / running_var tracking (eval mode) not implemented.
            row_sum = jnp.sum(ys[0], axis=0, keepdims=True)
            row_sq = jnp.sum(ys[0] * ys[0], axis=0, keepdims=True)
            for y in ys[1:]:
                row_sum = row_sum + jnp.sum(y, axis=0, keepdims=True)
                row_sq = row_sq + jnp.sum(y * y, axis=0, keepdims=True)
            stats = jnp.dot(jnp.concatenate([row_sum, row_sq], axis=0), grp_ref[...],
                            preferred_element_type=jnp.float32) * (1.0 / count)
            mean = stats[0:1, :]
            var = stats[1:2, :] - mean * mean
            rstd = jax.lax.rsqrt(var + BN_EPS)
            lanes = jnp.dot(jnp.concatenate([mean, rstd], axis=0), grp_t_ref[...],
                            preferred_element_type=jnp.float32)   # (2, ow*OC)
            mean_l, rstd_l = lanes[0:1, :], lanes[1:2, :]
            return [(y - mean_l) * rstd_l for y in ys]

        # Zero the padded activation buffers (padding rows must read as exactly 0).
        for ref in (a1_ref, a2_ref, a3_ref, a4_ref):
            ref[...] = jnp.zeros(ref.shape, f32)

        # In-kernel input staging: copy the raw (n*h, w) image rows into the padded
        # layer-1 buffer (this IS the zero padding; no host-side im2col/pad).
        h0 = layers[0][0]
        for nn in range(n):
            store_rows(a1_ref, nn, h0, x_ref[pl.ds(nn * h0, h0), :])

        w1v, w2v, w3v, w4v = w1_ref[...], w2_ref[...], w3_ref[...], w4_ref[...]

        # Layer 1: conv + LeakyReLU                    (16x16x1 -> 8x8xndf)
        for nn in range(n):
            store_rows(a2_ref, nn, layers[1][0],
                       lrelu(conv_image(a1_ref, w1v, nn, layers[0][0])))

        # Layer 2: conv + BatchNorm + LeakyReLU        (8x8xndf -> 4x4x2ndf)
        ys = [conv_image(a2_ref, w2v, nn, layers[1][0]) for nn in range(n)]
        ys = batchnorm(ys, s2_ref, s2t_ref,
                       n * _out_dim(layers[1][0]) * _out_dim(layers[1][1]))
        for nn in range(n):
            store_rows(a3_ref, nn, layers[2][0], lrelu(ys[nn]))

        # Layer 3: conv + BatchNorm + LeakyReLU        (4x4x2ndf -> 2x2x4ndf)
        ys = [conv_image(a3_ref, w3v, nn, layers[2][0]) for nn in range(n)]
        ys = batchnorm(ys, s3_ref, s3t_ref,
                       n * _out_dim(layers[2][0]) * _out_dim(layers[2][1]))
        for nn in range(n):
            store_rows(a4_ref, nn, layers[3][0], lrelu(ys[nn]))

        # Layer 4: conv -> raw logit per image (the only HBM store of the forward).
        for nn in range(n):
            o_ref[pl.ds(nn, 1), :] = conv_image(a4_ref, w4v, nn, layers[3][0])

    # ------------------------------ pallas_call -------------------------------

    def _spec(a):
        nd = a.ndim
        return pl.BlockSpec(a.shape, lambda i, _nd=nd: (0,) * _nd)

    flops = 0
    for (hh, ww, cc, oc, _) in layers:
        flops += n * 2 * _out_dim(hh) * (K * ww * cc) * (_out_dim(ww) * oc)
    bytes_accessed = (n * h * w * 4
                      + sum(int(a.size) * 4 for a in kernel_consts)
                      + n * 4)

    def forward(x):
        # Metadata-only reshape: (n,1,h,w) row-major == (n*h, w).
        x2d = x.reshape(n * h, w)
        args = (x2d,) + kernel_consts
        out = pl.pallas_call(
            kernel,
            grid=(1,),
            in_specs=[_spec(a) for a in args],
            out_specs=pl.BlockSpec((n, 1), lambda i: (0, 0)),
            out_shape=jax.ShapeDtypeStruct((n, 1), jnp.float32),
            scratch_shapes=scratch,
            compiler_params=pltpu.CompilerParams(
                dimension_semantics=("arbitrary",)),
            cost_estimate=pl.CostEstimate(
                flops=int(flops),
                transcendentals=2 * (NDF * 2 + NDF * 4),
                bytes_accessed=int(bytes_accessed)),
        )(*args)
        # .view(-1, 1).squeeze(1)
        return out.reshape(-1)

    return jax.jit(forward)


# --------------------------------- main --------------------------------------

if __name__ == "__main__":
    key = jax.random.PRNGKey(0)
    k1, k2, k3, k4, kx = jax.random.split(key, 5)

    # Deterministic DCGAN-style init: N(0, 0.02); bias=False everywhere.
    w1 = 0.02 * jax.random.normal(k1, (NDF, 1, 4, 4), jnp.float32)
    w2 = 0.02 * jax.random.normal(k2, (NDF * 2, NDF, 4, 4), jnp.float32)
    w3 = 0.02 * jax.random.normal(k3, (NDF * 4, NDF * 2, 4, 4), jnp.float32)
    w4 = 0.02 * jax.random.normal(k4, (1, NDF * 4, 4, 4), jnp.float32)
    params = (w1, w2, w3, w4)

    # Input: batch=2, 1 channel, 16x16 (halved 4 times -> 1x1 output).
    x = jax.random.normal(kx, (2, 1, 16, 16), jnp.float32)

    forward = build_mdiscriminator(params, x.shape)
    out = jax.block_until_ready(forward(x))
    assert out.shape == (2,), out.shape
    assert bool(jnp.all(jnp.isfinite(out))), out
    print("KERNEL_OK")
</pallas_src>

<mosaic_0001>
module attributes {stable_mosaic.version = 11 : i64} {
  func.func @kernel(%arg0: i32, %arg1: memref<32x16xf32, #tpu.memory_space<vmem>>, %arg2: memref<64x64xf32, #tpu.memory_space<vmem>>, %arg3: memref<256x64xf32, #tpu.memory_space<vmem>>, %arg4: memref<256x64xf32, #tpu.memory_space<vmem>>, %arg5: memref<256x1xf32, #tpu.memory_space<vmem>>, %arg6: memref<64x16xf32, #tpu.memory_space<vmem>>, %arg7: memref<16x64xf32, #tpu.memory_space<vmem>>, %arg8: memref<64x32xf32, #tpu.memory_space<vmem>>, %arg9: memref<32x64xf32, #tpu.memory_space<vmem>>, %arg10: memref<2x1xf32, #tpu.memory_space<vmem>>, %arg11: memref<36x16xf32, #tpu.memory_space<vmem>>, %arg12: memref<20x64xf32, #tpu.memory_space<vmem>>, %arg13: memref<12x64xf32, #tpu.memory_space<vmem>>, %arg14: memref<8x64xf32, #tpu.memory_space<vmem>>) attributes {dimension_semantics = [#tpu.dimension_semantics<arbitrary>], iteration_bounds = array<i64: 1>, scalar_prefetch = 0 : i64, scratch_operands = 4 : i64, tpu.core_type = #tpu.core_type<tc>, window_params = [{pipeline_mode = #tpu.pipeline_mode<synchronous>, transform_indices = @transform_0, window_bounds = array<i64: 32, 16>}, {pipeline_mode = #tpu.pipeline_mode<synchronous>, transform_indices = @transform_1, window_bounds = array<i64: 64, 64>}, {pipeline_mode = #tpu.pipeline_mode<synchronous>, transform_indices = @transform_2, window_bounds = array<i64: 256, 64>}, {pipeline_mode = #tpu.pipeline_mode<synchronous>, transform_indices = @transform_3, window_bounds = array<i64: 256, 64>}, {pipeline_mode = #tpu.pipeline_mode<synchronous>, transform_indices = @transform_4, window_bounds = array<i64: 256, 1>}, {pipeline_mode = #tpu.pipeline_mode<synchronous>, transform_indices = @transform_5, window_bounds = array<i64: 64, 16>}, {pipeline_mode = #tpu.pipeline_mode<synchronous>, transform_indices = @transform_6, window_bounds = array<i64: 16, 64>}, {pipeline_mode = #tpu.pipeline_mode<synchronous>, transform_indices = @transform_7, window_bounds = array<i64: 64, 32>}, {pipeline_mode = #tpu.pipeline_mode<synchronous>, transform_indices = @transform_8, window_bounds = array<i64: 32, 64>}, {pipeline_mode = #tpu.pipeline_mode<synchronous>, transform_indices = @transform_9, window_bounds = array<i64: 2, 1>}]} {
    %cst = arith.constant 0.000000e+00 : f32
    %0 = vector.broadcast %cst : f32 to vector<36x16xf32>
    %c0 = arith.constant 0 : index
    %c0_0 = arith.constant 0 : index
    %1 = vector.load %arg11[%c0, %c0_0] : memref<36x16xf32, #tpu.memory_space<vmem>>, vector<36x16xf32>
    tpu.vector_store %arg11[%c0, %c0_0], %0 {strides = array<i32>} : memref<36x16xf32, #tpu.memory_space<vmem>>, vector<36x16xf32>,
    %cst_1 = arith.constant 0.000000e+00 : f32
    %2 = vector.broadcast %cst_1 : f32 to vector<20x64xf32>
    %c0_2 = arith.constant 0 : index
    %c0_3 = arith.constant 0 : index
    %3 = vector.load %arg12[%c0_2, %c0_3] : memref<20x64xf32, #tpu.memory_space<vmem>>, vector<20x64xf32>
    tpu.vector_store %arg12[%c0_2, %c0_3], %2 {strides = array<i32>} : memref<20x64xf32, #tpu.memory_space<vmem>>, vector<20x64xf32>,
    %cst_4 = arith.constant 0.000000e+00 : f32
    %4 = vector.broadcast %cst_4 : f32 to vector<12x64xf32>
    %c0_5 = arith.constant 0 : index
    %c0_6 = arith.constant 0 : index
    %5 = vector.load %arg13[%c0_5, %c0_6] : memref<12x64xf32, #tpu.memory_space<vmem>>, vector<12x64xf32>
    tpu.vector_store %arg13[%c0_5, %c0_6], %4 {strides = array<i32>} : memref<12x64xf32, #tpu.memory_space<vmem>>, vector<12x64xf32>,
    %cst_7 = arith.constant 0.000000e+00 : f32
    %6 = vector.broadcast %cst_7 : f32 to vector<8x64xf32>
    %c0_8 = arith.constant 0 : index
    %c0_9 = arith.constant 0 : index
    %7 = vector.load %arg14[%c0_8, %c0_9] : memref<8x64xf32, #tpu.memory_space<vmem>>, vector<8x64xf32>
    tpu.vector_store %arg14[%c0_8, %c0_9], %6 {strides = array<i32>} : memref<8x64xf32, #tpu.memory_space<vmem>>, vector<8x64xf32>,
    %c0_10 = arith.constant 0 : index
    %c0_11 = arith.constant 0 : index
    %8 = vector.load %arg1[%c0_10, %c0_11] : memref<32x16xf32, #tpu.memory_space<vmem>>, vector<16x16xf32>
    %c1 = arith.constant 1 : index
    %c0_12 = arith.constant 0 : index
    %9 = vector.load %arg11[%c1, %c0_12] : memref<36x16xf32, #tpu.memory_space<vmem>>, vector<16x16xf32>
    tpu.vector_store %arg11[%c1, %c0_12], %8 {strides = array<i32>} : memref<36x16xf32, #tpu.memory_space<vmem>>, vector<16x16xf32>,
    %c16 = arith.constant 16 : index
    %c0_13 = arith.constant 0 : index
    %10 = vector.load %arg1[%c16, %c0_13] : memref<32x16xf32, #tpu.memory_space<vmem>>, vector<16x16xf32>
    %c19 = arith.constant 19 : index
    %c0_14 = arith.constant 0 : index
    %11 = vector.load %arg11[%c19, %c0_14] : memref<36x16xf32, #tpu.memory_space<vmem>>, vector<16x16xf32>
    tpu.vector_store %arg11[%c19, %c0_14], %10 {strides = array<i32>} : memref<36x16xf32, #tpu.memory_space<vmem>>, vector<16x16xf32>,
    %c0_15 = arith.constant 0 : index
    %c0_16 = arith.constant 0 : index
    %12 = vector.load %arg2[%c0_15, %c0_16] : memref<64x64xf32, #tpu.memory_space<vmem>>, vector<64x64xf32>
    %c0_17 = arith.constant 0 : index
    %c0_18 = arith.constant 0 : index
    %13 = vector.load %arg3[%c0_17, %c0_18] : memref<256x64xf32, #tpu.memory_space<vmem>>, vector<256x64xf32>
    %c0_19 = arith.constant 0 : index
    %c0_20 = arith.constant 0 : index
    %14 = vector.load %arg4[%c0_19, %c0_20] : memref<256x64xf32, #tpu.memory_space<vmem>>, vector<256x64xf32>
    %c0_21 = arith.constant 0 : index
    %c0_22 = arith.constant 0 : index
    %15 = vector.load %arg5[%c0_21, %c0_22] : memref<256x1xf32, #tpu.memory_space<vmem>>, vector<256x1xf32>
    %c0_23 = arith.constant 0 : index
    %c0_24 = arith.constant 0 : index
    %16 = tpu.strided_load %arg11[%c0_23, %c0_24] {strides = array<i32: 2, 1>} : memref<36x16xf32, #tpu.memory_space<vmem>>, vector<8x16xf32>
    %c1_25 = arith.constant 1 : index
    %c0_26 = arith.constant 0 : index
    %17 = tpu.strided_load %arg11[%c1_25, %c0_26] {strides = array<i32: 2, 1>} : memref<36x16xf32, #tpu.memory_space<vmem>>, vector<8x16xf32>
    %c2 = arith.constant 2 : index
    %c0_27 = arith.constant 0 : index
    %18 = tpu.strided_load %arg11[%c2, %c0_27] {strides = array<i32: 2, 1>} : memref<36x16xf32, #tpu.memory_space<vmem>>, vector<8x16xf32>
    %c3 = arith.constant 3 : index
    %c0_28 = arith.constant 0 : index
    %19 = tpu.strided_load %arg11[%c3, %c0_28] {strides = array<i32: 2, 1>} : memref<36x16xf32, #tpu.memory_space<vmem>>, vector<8x16xf32>
    %20 = tpu.concatenate %16, %17, %18, %19 in 1 : vector<8x16xf32>, vector<8x16xf32>, vector<8x16xf32>, vector<8x16xf32> -> vector<8x64xf32>
    %cst_29 = arith.constant dense<0.000000e+00> : vector<8x64xf32>
    %21 = tpu.matmul %20, %12, %cst_29 {dimension_numbers = #tpu.dot_dimension_numbers<[1], [0], [0], [1], [0, 0, 1, 1], [], []>} : vector<8x64xf32>, vector<64x64xf32>, vector<8x64xf32> -> vector<8x64xf32>
    %cst_30 = arith.constant 0.000000e+00 : f32
    %22 = vector.broadcast %cst_30 : f32 to vector<8x64xf32>
    %23 = arith.cmpf oge, %21, %22 : vector<8x64xf32>
    %cst_31 = arith.constant 2.000000e-01 : f32
    %24 = vector.broadcast %cst_31 : f32 to vector<8x64xf32>
    %25 = arith.mulf %24, %21 : vector<8x64xf32>
    %26 = arith.select %23, %21, %25 : vector<8x64xi1>, vector<8x64xf32>
    %c1_32 = arith.constant 1 : index
    %c0_33 = arith.constant 0 : index
    %27 = vector.load %arg12[%c1_32, %c0_33] : memref<20x64xf32, #tpu.memory_space<vmem>>, vector<8x64xf32>
    tpu.vector_store %arg12[%c1_32, %c0_33], %26 {strides = array<i32>} : memref<20x64xf32, #tpu.memory_space<vmem>>, vector<8x64xf32>,
    %c18 = arith.constant 18 : index
    %c0_34 = arith.constant 0 : index
    %28 = tpu.strided_load %arg11[%c18, %c0_34] {strides = array<i32: 2, 1>} : memref<36x16xf32, #tpu.memory_space<vmem>>, vector<8x16xf32>
    %c19_35 = arith.constant 19 : index
    %c0_36 = arith.constant 0 : index
    %29 = tpu.strided_load %arg11[%c19_35, %c0_36] {strides = array<i32: 2, 1>} : memref<36x16xf32, #tpu.memory_space<vmem>>, vector<8x16xf32>
    %c20 = arith.constant 20 : index
    %c0_37 = arith.constant 0 : index
    %30 = tpu.strided_load %arg11[%c20, %c0_37] {strides = array<i32: 2, 1>} : memref<36x16xf32, #tpu.memory_space<vmem>>, vector<8x16xf32>
    %c21 = arith.constant 21 : index
    %c0_38 = arith.constant 0 : index
    %31 = tpu.strided_load %arg11[%c21, %c0_38] {strides = array<i32: 2, 1>} : memref<36x16xf32, #tpu.memory_space<vmem>>, vector<8x16xf32>
    %32 = tpu.concatenate %28, %29, %30, %31 in 1 : vector<8x16xf32>, vector<8x16xf32>, vector<8x16xf32>, vector<8x16xf32> -> vector<8x64xf32>
    %cst_39 = arith.constant dense<0.000000e+00> : vector<8x64xf32>
    %33 = tpu.matmul %32, %12, %cst_39 {dimension_numbers = #tpu.dot_dimension_numbers<[1], [0], [0], [1], [0, 0, 1, 1], [], []>} : vector<8x64xf32>, vector<64x64xf32>, vector<8x64xf32> -> vector<8x64xf32>
    %cst_40 = arith.constant 0.000000e+00 : f32
    %34 = vector.broadcast %cst_40 : f32 to vector<8x64xf32>
    %35 = arith.cmpf oge, %33, %34 : vector<8x64xf32>
    %cst_41 = arith.constant 2.000000e-01 : f32
    %36 = vector.broadcast %cst_41 : f32 to vector<8x64xf32>
    %37 = arith.mulf %36, %33 : vector<8x64xf32>
    %38 = arith.select %35, %33, %37 : vector<8x64xi1>, vector<8x64xf32>
    %c11 = arith.constant 11 : index
    %c0_42 = arith.constant 0 : index
    %39 = vector.load %arg12[%c11, %c0_42] : memref<20x64xf32, #tpu.memory_space<vmem>>, vector<8x64xf32>
    tpu.vector_store %arg12[%c11, %c0_42], %38 {strides = array<i32>} : memref<20x64xf32, #tpu.memory_space<vmem>>, vector<8x64xf32>,
    %c0_43 = arith.constant 0 : index
    %c0_44 = arith.constant 0 : index
    %40 = tpu.strided_load %arg12[%c0_43, %c0_44] {strides = array<i32: 2, 1>} : memref<20x64xf32, #tpu.memory_space<vmem>>, vector<4x64xf32>
    %c1_45 = arith.constant 1 : index
    %c0_46 = arith.constant 0 : index
    %41 = tpu.strided_load %arg12[%c1_45, %c0_46] {strides = array<i32: 2, 1>} : memref<20x64xf32, #tpu.memory_space<vmem>>, vector<4x64xf32>
    %c2_47 = arith.constant 2 : index
    %c0_48 = arith.constant 0 : index
    %42 = tpu.strided_load %arg12[%c2_47, %c0_48] {strides = array<i32: 2, 1>} : memref<20x64xf32, #tpu.memory_space<vmem>>, vector<4x64xf32>
    %c3_49 = arith.constant 3 : index
    %c0_50 = arith.constant 0 : index
    %43 = tpu.strided_load %arg12[%c3_49, %c0_50] {strides = array<i32: 2, 1>} : memref<20x64xf32, #tpu.memory_space<vmem>>, vector<4x64xf32>
    %44 = tpu.concatenate %40, %41, %42, %43 in 1 : vector<4x64xf32>, vector<4x64xf32>, vector<4x64xf32>, vector<4x64xf32> -> vector<4x256xf32>
    %cst_51 = arith.constant dense<0.000000e+00> : vector<4x64xf32>
    %45 = tpu.matmul %44, %13, %cst_51 {dimension_numbers = #tpu.dot_dimension_numbers<[1], [0], [0], [1], [0, 0, 1, 1], [], []>} : vector<4x256xf32>, vector<256x64xf32>, vector<4x64xf32> -> vector<4x64xf32>
    %c10 = arith.constant 10 : index
    %c0_52 = arith.constant 0 : index
    %46 = tpu.strided_load %arg12[%c10, %c0_52] {strides = array<i32: 2, 1>} : memref<20x64xf32, #tpu.memory_space<vmem>>, vector<4x64xf32>
    %c11_53 = arith.constant 11 : index
    %c0_54 = arith.constant 0 : index
    %47 = tpu.strided_load %arg12[%c11_53, %c0_54] {strides = array<i32: 2, 1>} : memref<20x64xf32, #tpu.memory_space<vmem>>, vector<4x64xf32>
    %c12 = arith.constant 12 : index
    %c0_55 = arith.constant 0 : index
    %48 = tpu.strided_load %arg12[%c12, %c0_55] {strides = array<i32: 2, 1>} : memref<20x64xf32, #tpu.memory_space<vmem>>, vector<4x64xf32>
    %c13 = arith.constant 13 : index
    %c0_56 = arith.constant 0 : index
    %49 = tpu.strided_load %arg12[%c13, %c0_56] {strides = array<i32: 2, 1>} : memref<20x64xf32, #tpu.memory_space<vmem>>, vector<4x64xf32>
    %50 = tpu.concatenate %46, %47, %48, %49 in 1 : vector<4x64xf32>, vector<4x64xf32>, vector<4x64xf32>, vector<4x64xf32> -> vector<4x256xf32>
    %cst_57 = arith.constant dense<0.000000e+00> : vector<4x64xf32>
    %51 = tpu.matmul %50, %13, %cst_57 {dimension_numbers = #tpu.dot_dimension_numbers<[1], [0], [0], [1], [0, 0, 1, 1], [], []>} : vector<4x256xf32>, vector<256x64xf32>, vector<4x64xf32> -> vector<4x64xf32>
    %cst_58 = arith.constant dense<0.000000e+00> : vector<64xf32>
    %52 = vector.multi_reduction <add>, %45, %cst_58 [0] : vector<4x64xf32> to vector<64xf32>
    %53 = vector.shape_cast %52 : vector<64xf32> to vector<1x64xf32>
    %54 = arith.mulf %45, %45 : vector<4x64xf32>
    %cst_59 = arith.constant dense<0.000000e+00> : vector<64xf32>
    %55 = vector.multi_reduction <add>, %54, %cst_59 [0] : vector<4x64xf32> to vector<64xf32>
    %56 = vector.shape_cast %55 : vector<64xf32> to vector<1x64xf32>
    %cst_60 = arith.constant dense<0.000000e+00> : vector<64xf32>
    %57 = vector.multi_reduction <add>, %51, %cst_60 [0] : vector<4x64xf32> to vector<64xf32>
    %58 = vector.shape_cast %57 : vector<64xf32> to vector<1x64xf32>
    %59 = arith.addf %53, %58 : vector<1x64xf32>
    %60 = arith.mulf %51, %51 : vector<4x64xf32>
    %cst_61 = arith.constant dense<0.000000e+00> : vector<64xf32>
    %61 = vector.multi_reduction <add>, %60, %cst_61 [0] : vector<4x64xf32> to vector<64xf32>
    %62 = vector.shape_cast %61 : vector<64xf32> to vector<1x64xf32>
    %63 = arith.addf %56, %62 : vector<1x64xf32>
    %64 = tpu.concatenate %59, %63 in 0 : vector<1x64xf32>, vector<1x64xf32> -> vector<2x64xf32>
    %c0_62 = arith.constant 0 : index
    %c0_63 = arith.constant 0 : index
    %65 = vector.load %arg6[%c0_62, %c0_63] : memref<64x16xf32, #tpu.memory_space<vmem>>, vector<64x16xf32>
    %cst_64 = arith.constant dense<0.000000e+00> : vector<2x16xf32>
    %66 = tpu.matmul %64, %65, %cst_64 {dimension_numbers = #tpu.dot_dimension_numbers<[1], [0], [0], [1], [0, 0, 1, 1], [], []>} : vector<2x64xf32>, vector<64x16xf32>, vector<2x16xf32> -> vector<2x16xf32>
    %cst_65 = arith.constant 3.125000e-02 : f32
    %67 = vector.broadcast %cst_65 : f32 to vector<2x16xf32>
    %68 = arith.mulf %66, %67 : vector<2x16xf32>
    %69 = vector.extract_strided_slice %68 {offsets = [0, 0], sizes = [1, 16], strides = [1, 1]} : vector<2x16xf32> to vector<1x16xf32>
    %70 = vector.extract_strided_slice %68 {offsets = [1, 0], sizes = [1, 16], strides = [1, 1]} : vector<2x16xf32> to vector<1x16xf32>
    %71 = arith.mulf %69, %69 : vector<1x16xf32>
    %72 = arith.subf %70, %71 : vector<1x16xf32>
    %cst_66 = arith.constant 9.99999974E-6 : f32
    %73 = vector.broadcast %cst_66 : f32 to vector<1x16xf32>
    %74 = arith.addf %72, %73 : vector<1x16xf32>
    %75 = math.rsqrt %74 : vector<1x16xf32>
    %76 = tpu.concatenate %69, %75 in 0 : vector<1x16xf32>, vector<1x16xf32> -> vector<2x16xf32>
    %c0_67 = arith.constant 0 : index
    %c0_68 = arith.constant 0 : index
    %77 = vector.load %arg7[%c0_67, %c0_68] : memref<16x64xf32, #tpu.memory_space<vmem>>, vector<16x64xf32>
    %cst_69 = arith.constant dense<0.000000e+00> : vector<2x64xf32>
    %78 = tpu.matmul %76, %77, %cst_69 {dimension_numbers = #tpu.dot_dimension_numbers<[1], [0], [0], [1], [0, 0, 1, 1], [], []>} : vector<2x16xf32>, vector<16x64xf32>, vector<2x64xf32> -> vector<2x64xf32>
    %79 = vector.extract_strided_slice %78 {offsets = [0, 0], sizes = [1, 64], strides = [1, 1]} : vector<2x64xf32> to vector<1x64xf32>
    %80 = vector.extract_strided_slice %78 {offsets = [1, 0], sizes = [1, 64], strides = [1, 1]} : vector<2x64xf32> to vector<1x64xf32>
    %81 = vector.broadcast %79 : vector<1x64xf32> to vector<4x64xf32>
    %82 = arith.subf %45, %81 : vector<4x64xf32>
    %83 = vector.broadcast %80 : vector<1x64xf32> to vector<4x64xf32>
    %84 = arith.mulf %82, %83 : vector<4x64xf32>
    %85 = vector.broadcast %79 : vector<1x64xf32> to vector<4x64xf32>
    %86 = arith.subf %51, %85 : vector<4x64xf32>
    %87 = vector.broadcast %80 : vector<1x64xf32> to vector<4x64xf32>
    %88 = arith.mulf %86, %87 : vector<4x64xf32>
    %cst_70 = arith.constant 0.000000e+00 : f32
    %89 = vector.broadcast %cst_70 : f32 to vector<4x64xf32>
    %90 = arith.cmpf oge, %84, %89 : vector<4x64xf32>
    %cst_71 = arith.constant 2.000000e-01 : f32
    %91 = vector.broadcast %cst_71 : f32 to vector<4x64xf32>
    %92 = arith.mulf %91, %84 : vector<4x64xf32>
    %93 = arith.select %90, %84, %92 : vector<4x64xi1>, vector<4x64xf32>
    %c1_72 = arith.constant 1 : index
    %c0_73 = arith.constant 0 : index
    %94 = vector.load %arg13[%c1_72, %c0_73] : memref<12x64xf32, #tpu.memory_space<vmem>>, vector<4x64xf32>
    tpu.vector_store %arg13[%c1_72, %c0_73], %93 {strides = array<i32>} : memref<12x64xf32, #tpu.memory_space<vmem>>, vector<4x64xf32>,
    %cst_74 = arith.constant 0.000000e+00 : f32
    %95 = vector.broadcast %cst_74 : f32 to vector<4x64xf32>
    %96 = arith.cmpf oge, %88, %95 : vector<4x64xf32>
    %cst_75 = arith.constant 2.000000e-01 : f32
    %97 = vector.broadcast %cst_75 : f32 to vector<4x64xf32>
    %98 = arith.mulf %97, %88 : vector<4x64xf32>
    %99 = arith.select %96, %88, %98 : vector<4x64xi1>, vector<4x64xf32>
    %c7 = arith.constant 7 : index
    %c0_76 = arith.constant 0 : index
    %100 = vector.load %arg13[%c7, %c0_76] : memref<12x64xf32, #tpu.memory_space<vmem>>, vector<4x64xf32>
    tpu.vector_store %arg13[%c7, %c0_76], %99 {strides = array<i32>} : memref<12x64xf32, #tpu.memory_space<vmem>>, vector<4x64xf32>,
    %c0_77 = arith.constant 0 : index
    %c0_78 = arith.constant 0 : index
    %101 = tpu.strided_load %arg13[%c0_77, %c0_78] {strides = array<i32: 2, 1>} : memref<12x64xf32, #tpu.memory_space<vmem>>, vector<2x64xf32>
    %c1_79 = arith.constant 1 : index
    %c0_80 = arith.constant 0 : index
    %102 = tpu.strided_load %arg13[%c1_79, %c0_80] {strides = array<i32: 2, 1>} : memref<12x64xf32, #tpu.memory_space<vmem>>, vector<2x64xf32>
    %c2_81 = arith.constant 2 : index
    %c0_82 = arith.constant 0 : index
    %103 = tpu.strided_load %arg13[%c2_81, %c0_82] {strides = array<i32: 2, 1>} : memref<12x64xf32, #tpu.memory_space<vmem>>, vector<2x64xf32>
    %c3_83 = arith.constant 3 : index
    %c0_84 = arith.constant 0 : index
    %104 = tpu.strided_load %arg13[%c3_83, %c0_84] {strides = array<i32: 2, 1>} : memref<12x64xf32, #tpu.memory_space<vmem>>, vector<2x64xf32>
    %105 = tpu.concatenate %101, %102, %103, %104 in 1 : vector<2x64xf32>, vector<2x64xf32>, vector<2x64xf32>, vector<2x64xf32> -> vector<2x256xf32>
    %cst_85 = arith.constant dense<0.000000e+00> : vector<2x64xf32>
    %106 = tpu.matmul %105, %14, %cst_85 {dimension_numbers = #tpu.dot_dimension_numbers<[1], [0], [0], [1], [0, 0, 1, 1], [], []>} : vector<2x256xf32>, vector<256x64xf32>, vector<2x64xf32> -> vector<2x64xf32>
    %c6 = arith.constant 6 : index
    %c0_86 = arith.constant 0 : index
    %107 = tpu.strided_load %arg13[%c6, %c0_86] {strides = array<i32: 2, 1>} : memref<12x64xf32, #tpu.memory_space<vmem>>, vector<2x64xf32>
    %c7_87 = arith.constant 7 : index
    %c0_88 = arith.constant 0 : index
    %108 = tpu.strided_load %arg13[%c7_87, %c0_88] {strides = array<i32: 2, 1>} : memref<12x64xf32, #tpu.memory_space<vmem>>, vector<2x64xf32>
    %c8 = arith.constant 8 : index
    %c0_89 = arith.constant 0 : index
    %109 = tpu.strided_load %arg13[%c8, %c0_89] {strides = array<i32: 2, 1>} : memref<12x64xf32, #tpu.memory_space<vmem>>, vector<2x64xf32>
    %c9 = arith.constant 9 : index
    %c0_90 = arith.constant 0 : index
    %110 = tpu.strided_load %arg13[%c9, %c0_90] {strides = array<i32: 2, 1>} : memref<12x64xf32, #tpu.memory_space<vmem>>, vector<2x64xf32>
    %111 = tpu.concatenate %107, %108, %109, %110 in 1 : vector<2x64xf32>, vector<2x64xf32>, vector<2x64xf32>, vector<2x64xf32> -> vector<2x256xf32>
    %cst_91 = arith.constant dense<0.000000e+00> : vector<2x64xf32>
    %112 = tpu.matmul %111, %14, %cst_91 {dimension_numbers = #tpu.dot_dimension_numbers<[1], [0], [0], [1], [0, 0, 1, 1], [], []>} : vector<2x256xf32>, vector<256x64xf32>, vector<2x64xf32> -> vector<2x64xf32>
    %cst_92 = arith.constant dense<0.000000e+00> : vector<64xf32>
    %113 = vector.multi_reduction <add>, %106, %cst_92 [0] : vector<2x64xf32> to vector<64xf32>
    %114 = vector.shape_cast %113 : vector<64xf32> to vector<1x64xf32>
    %115 = arith.mulf %106, %106 : vector<2x64xf32>
    %cst_93 = arith.constant dense<0.000000e+00> : vector<64xf32>
    %116 = vector.multi_reduction <add>, %115, %cst_93 [0] : vector<2x64xf32> to vector<64xf32>
    %117 = vector.shape_cast %116 : vector<64xf32> to vector<1x64xf32>
    %cst_94 = arith.constant dense<0.000000e+00> : vector<64xf32>
    %118 = vector.multi_reduction <add>, %112, %cst_94 [0] : vector<2x64xf32> to vector<64xf32>
    %119 = vector.shape_cast %118 : vector<64xf32> to vector<1x64xf32>
    %120 = arith.addf %114, %119 : vector<1x64xf32>
    %121 = arith.mulf %112, %112 : vector<2x64xf32>
    %cst_95 = arith.constant dense<0.000000e+00> : vector<64xf32>
    %122 = vector.multi_reduction <add>, %121, %cst_95 [0] : vector<2x64xf32> to vector<64xf32>
    %123 = vector.shape_cast %122 : vector<64xf32> to vector<1x64xf32>
    %124 = arith.addf %117, %123 : vector<1x64xf32>
    %125 = tpu.concatenate %120, %124 in 0 : vector<1x64xf32>, vector<1x64xf32> -> vector<2x64xf32>
    %c0_96 = arith.constant 0 : index
    %c0_97 = arith.constant 0 : index
    %126 = vector.load %arg8[%c0_96, %c0_97] : memref<64x32xf32, #tpu.memory_space<vmem>>, vector<64x32xf32>
    %cst_98 = arith.constant dense<0.000000e+00> : vector<2x32xf32>
    %127 = tpu.matmul %125, %126, %cst_98 {dimension_numbers = #tpu.dot_dimension_numbers<[1], [0], [0], [1], [0, 0, 1, 1], [], []>} : vector<2x64xf32>, vector<64x32xf32>, vector<2x32xf32> -> vector<2x32xf32>
    %cst_99 = arith.constant 1.250000e-01 : f32
    %128 = vector.broadcast %cst_99 : f32 to vector<2x32xf32>
    %129 = arith.mulf %127, %128 : vector<2x32xf32>
    %130 = vector.extract_strided_slice %129 {offsets = [0, 0], sizes = [1, 32], strides = [1, 1]} : vector<2x32xf32> to vector<1x32xf32>
    %131 = vector.extract_strided_slice %129 {offsets = [1, 0], sizes = [1, 32], strides = [1, 1]} : vector<2x32xf32> to vector<1x32xf32>
    %132 = arith.mulf %130, %130 : vector<1x32xf32>
    %133 = arith.subf %131, %132 : vector<1x32xf32>
    %cst_100 = arith.constant 9.99999974E-6 : f32
    %134 = vector.broadcast %cst_100 : f32 to vector<1x32xf32>
    %135 = arith.addf %133, %134 : vector<1x32xf32>
    %136 = math.rsqrt %135 : vector<1x32xf32>
    %137 = tpu.concatenate %130, %136 in 0 : vector<1x32xf32>, vector<1x32xf32> -> vector<2x32xf32>
    %c0_101 = arith.constant 0 : index
    %c0_102 = arith.constant 0 : index
    %138 = vector.load %arg9[%c0_101, %c0_102] : memref<32x64xf32, #tpu.memory_space<vmem>>, vector<32x64xf32>
    %cst_103 = arith.constant dense<0.000000e+00> : vector<2x64xf32>
    %139 = tpu.matmul %137, %138, %cst_103 {dimension_numbers = #tpu.dot_dimension_numbers<[1], [0], [0], [1], [0, 0, 1, 1], [], []>} : vector<2x32xf32>, vector<32x64xf32>, vector<2x64xf32> -> vector<2x64xf32>
    %140 = vector.extract_strided_slice %139 {offsets = [0, 0], sizes = [1, 64], strides = [1, 1]} : vector<2x64xf32> to vector<1x64xf32>
    %141 = vector.extract_strided_slice %139 {offsets = [1, 0], sizes = [1, 64], strides = [1, 1]} : vector<2x64xf32> to vector<1x64xf32>
    %142 = vector.broadcast %140 : vector<1x64xf32> to vector<2x64xf32>
    %143 = arith.subf %106, %142 : vector<2x64xf32>
    %144 = vector.broadcast %141 : vector<1x64xf32> to vector<2x64xf32>
    %145 = arith.mulf %143, %144 : vector<2x64xf32>
    %146 = vector.broadcast %140 : vector<1x64xf32> to vector<2x64xf32>
    %147 = arith.subf %112, %146 : vector<2x64xf32>
    %148 = vector.broadcast %141 : vector<1x64xf32> to vector<2x64xf32>
    %149 = arith.mulf %147, %148 : vector<2x64xf32>
    %cst_104 = arith.constant 0.000000e+00 : f32
    %150 = vector.broadcast %cst_104 : f32 to vector<2x64xf32>
    %151 = arith.cmpf oge, %145, %150 : vector<2x64xf32>
    %cst_105 = arith.constant 2.000000e-01 : f32
    %152 = vector.broadcast %cst_105 : f32 to vector<2x64xf32>
    %153 = arith.mulf %152, %145 : vector<2x64xf32>
    %154 = arith.select %151, %145, %153 : vector<2x64xi1>, vector<2x64xf32>
    %c1_106 = arith.constant 1 : index
    %c0_107 = arith.constant 0 : index
    %155 = vector.load %arg14[%c1_106, %c0_107] : memref<8x64xf32, #tpu.memory_space<vmem>>, vector<2x64xf32>
    tpu.vector_store %arg14[%c1_106, %c0_107], %154 {strides = array<i32>} : memref<8x64xf32, #tpu.memory_space<vmem>>, vector<2x64xf32>,
    %cst_108 = arith.constant 0.000000e+00 : f32
    %156 = vector.broadcast %cst_108 : f32 to vector<2x64xf32>
    %157 = arith.cmpf oge, %149, %156 : vector<2x64xf32>
    %cst_109 = arith.constant 2.000000e-01 : f32
    %158 = vector.broadcast %cst_109 : f32 to vector<2x64xf32>
    %159 = arith.mulf %158, %149 : vector<2x64xf32>
    %160 = arith.select %157, %149, %159 : vector<2x64xi1>, vector<2x64xf32>
    %c5 = arith.constant 5 : index
    %c0_110 = arith.constant 0 : index
    %161 = vector.load %arg14[%c5, %c0_110] : memref<8x64xf32, #tpu.memory_space<vmem>>, vector<2x64xf32>
    tpu.vector_store %arg14[%c5, %c0_110], %160 {strides = array<i32>} : memref<8x64xf32, #tpu.memory_space<vmem>>, vector<2x64xf32>,
    %c0_111 = arith.constant 0 : index
    %c0_112 = arith.constant 0 : index
    %162 = vector.load %arg14[%c0_111, %c0_112] : memref<8x64xf32, #tpu.memory_space<vmem>>, vector<1x64xf32>
    %c1_113 = arith.constant 1 : index
    %c0_114 = arith.constant 0 : index
    %163 = vector.load %arg14[%c1_113, %c0_114] : memref<8x64xf32, #tpu.memory_space<vmem>>, vector<1x64xf32>
    %c2_115 = arith.constant 2 : index
    %c0_116 = arith.constant 0 : index
    %164 = vector.load %arg14[%c2_115, %c0_116] : memref<8x64xf32, #tpu.memory_space<vmem>>, vector<1x64xf32>
    %c3_117 = arith.constant 3 : index
    %c0_118 = arith.constant 0 : index
    %165 = vector.load %arg14[%c3_117, %c0_118] : memref<8x64xf32, #tpu.memory_space<vmem>>, vector<1x64xf32>
    %166 = tpu.concatenate %162, %163, %164, %165 in 1 : vector<1x64xf32>, vector<1x64xf32>, vector<1x64xf32>, vector<1x64xf32> -> vector<1x256xf32>
    %cst_119 = arith.constant dense<0.000000e+00> : vector<1x1xf32>
    %167 = tpu.matmul %166, %15, %cst_119 {dimension_numbers = #tpu.dot_dimension_numbers<[1], [0], [0], [1], [0, 0, 1, 1], [], []>} : vector<1x256xf32>, vector<256x1xf32>, vector<1x1xf32> -> vector<1x1xf32>
    %c0_120 = arith.constant 0 : index
    %c0_121 = arith.constant 0 : index
    %168 = vector.load %arg10[%c0_120, %c0_121] : memref<2x1xf32, #tpu.memory_space<vmem>>, vector<1x1xf32>
    tpu.vector_store %arg10[%c0_120, %c0_121], %167 {strides = array<i32>} : memref<2x1xf32, #tpu.memory_space<vmem>>, vector<1x1xf32>,
    %c4 = arith.constant 4 : index
    %c0_122 = arith.constant 0 : index
    %169 = vector.load %arg14[%c4, %c0_122] : memref<8x64xf32, #tpu.memory_space<vmem>>, vector<1x64xf32>
    %c5_123 = arith.constant 5 : index
    %c0_124 = arith.constant 0 : index
    %170 = vector.load %arg14[%c5_123, %c0_124] : memref<8x64xf32, #tpu.memory_space<vmem>>, vector<1x64xf32>
    %c6_125 = arith.constant 6 : index
    %c0_126 = arith.constant 0 : index
    %171 = vector.load %arg14[%c6_125, %c0_126] : memref<8x64xf32, #tpu.memory_space<vmem>>, vector<1x64xf32>
    %c7_127 = arith.constant 7 : index
    %c0_128 = arith.constant 0 : index
    %172 = vector.load %arg14[%c7_127, %c0_128] : memref<8x64xf32, #tpu.memory_space<vmem>>, vector<1x64xf32>
    %173 = tpu.concatenate %169, %170, %171, %172 in 1 : vector<1x64xf32>, vector<1x64xf32>, vector<1x64xf32>, vector<1x64xf32> -> vector<1x256xf32>
    %cst_129 = arith.constant dense<0.000000e+00> : vector<1x1xf32>
    %174 = tpu.matmul %173, %15, %cst_129 {dimension_numbers = #tpu.dot_dimension_numbers<[1], [0], [0], [1], [0, 0, 1, 1], [], []>} : vector<1x256xf32>, vector<256x1xf32>, vector<1x1xf32> -> vector<1x1xf32>
    %c1_130 = arith.constant 1 : index
    %c0_131 = arith.constant 0 : index
    %175 = vector.load %arg10[%c1_130, %c0_131] : memref<2x1xf32, #tpu.memory_space<vmem>>, vector<1x1xf32>
    tpu.vector_store %arg10[%c1_130, %c0_131], %174 {strides = array<i32>} : memref<2x1xf32, #tpu.memory_space<vmem>>, vector<1x1xf32>,
    return
  }
  func.func @transform_0(%arg0: i32) -> (i32, i32) {
    %c0_i32 = arith.constant 0 : i32
    %c0_i32_0 = arith.constant 0 : i32
    %c0_i32_1 = arith.constant 0 : i32
    return %c0_i32, %c0_i32_0 : i32, i32
  }
  func.func @transform_1(%arg0: i32) -> (i32, i32) {
    %c0_i32 = arith.constant 0 : i32
    %c0_i32_0 = arith.constant 0 : i32
    %c0_i32_1 = arith.constant 0 : i32
    return %c0_i32, %c0_i32_0 : i32, i32
  }
  func.func @transform_2(%arg0: i32) -> (i32, i32) {
    %c0_i32 = arith.constant 0 : i32
    %c0_i32_0 = arith.constant 0 : i32
    %c0_i32_1 = arith.constant 0 : i32
    return %c0_i32, %c0_i32_0 : i32, i32
  }
  func.func @transform_3(%arg0: i32) -> (i32, i32) {
    %c0_i32 = arith.constant 0 : i32
    %c0_i32_0 = arith.constant 0 : i32
    %c0_i32_1 = arith.constant 0 : i32
    return %c0_i32, %c0_i32_0 : i32, i32
  }
  func.func @transform_4(%arg0: i32) -> (i32, i32) {
    %c0_i32 = arith.constant 0 : i32
    %c0_i32_0 = arith.constant 0 : i32
    %c0_i32_1 = arith.constant 0 : i32
    return %c0_i32, %c0_i32_0 : i32, i32
  }
  func.func @transform_5(%arg0: i32) -> (i32, i32) {
    %c0_i32 = arith.constant 0 : i32
    %c0_i32_0 = arith.constant 0 : i32
    %c0_i32_1 = arith.constant 0 : i32
    return %c0_i32, %c0_i32_0 : i32, i32
  }
  func.func @transform_6(%arg0: i32) -> (i32, i32) {
    %c0_i32 = arith.constant 0 : i32
    %c0_i32_0 = arith.constant 0 : i32
    %c0_i32_1 = arith.constant 0 : i32
    return %c0_i32, %c0_i32_0 : i32, i32
  }
  func.func @transform_7(%arg0: i32) -> (i32, i32) {
    %c0_i32 = arith.constant 0 : i32
    %c0_i32_0 = arith.constant 0 : i32
    %c0_i32_1 = arith.constant 0 : i32
    return %c0_i32, %c0_i32_0 : i32, i32
  }
  func.func @transform_8(%arg0: i32) -> (i32, i32) {
    %c0_i32 = arith.constant 0 : i32
    %c0_i32_0 = arith.constant 0 : i32
    %c0_i32_1 = arith.constant 0 : i32
    return %c0_i32, %c0_i32_0 : i32, i32
  }
  func.func @transform_9(%arg0: i32) -> (i32, i32) {
    %c0_i32 = arith.constant 0 : i32
    %c0_i32_0 = arith.constant 0 : i32
    %c0_i32_1 = arith.constant 0 : i32
    return %c0_i32, %c0_i32_0 : i32, i32
  }
}

</mosaic_0001>

<bundles_post_ra>
// kernel: forward.1
= control target key start
LH: loop header
LB: loop body
LE: loop exit
PB: predicated region body
PF: predicated region fallthrough
CT: control target
= control target key end

     0   :  { %14 = vsyncpa [#allocation7], 0  ;;  %s1499_s0 = inlined_call_operand.hbm [shape: f32[32,16], index: 0, kind: input, shape index: {}]   ;;  %s1500_s1 = inlined_call_operand.hbm [shape: f32[64,64], index: 1, kind: input, shape index: {}]   ;;  %s1501_s2 = inlined_call_operand.hbm [shape: f32[256,64], index: 2, kind: input, shape index: {}]   ;;  %s1502_s3 = inlined_call_operand.hbm [shape: f32[256,64], index: 3, kind: input, shape index: {}]   ;;  %s1503_s4 = inlined_call_operand.hbm [shape: f32[256,1], index: 4, kind: input, shape index: {}]   ;;  %s1504_s5 = inlined_call_operand.hbm [shape: f32[64,16], index: 5, kind: input, shape index: {}]   ;;  %s1505_s6 = inlined_call_operand.hbm [shape: f32[16,64], index: 6, kind: input, shape index: {}]   ;;  %s1506_s7 = inlined_call_operand.hbm [shape: f32[64,32], index: 7, kind: input, shape index: {}]   ;;  %s1507_s8 = inlined_call_operand.hbm [shape: f32[32,64], index: 8, kind: input, shape index: {}]   ;;  %s1508_s9 = inlined_call_operand.vmem [shape: f32[2,1], index: 9, kind: output, shape index: {}]  }
   0x1   :  { %15 = vsyncpa [#allocation9], 0 }
   0x2   :  { %16 = vsyncpa [#allocation12], 0 }
   0x3   :  { %17 = vsyncpa [#allocation15], 0 }
   0x4   :  { %18 = vsyncpa [#allocation18], 0  ;;  %s36_s11 = sshll.u32 %s1500_s1, 4  ;;  %s1278_s12 = smov [#allocation8]   ;;  %s37_s11 = int_to_ptr.hbm [resolvable:$true] %s36_s11 }
   0x5   :  { %s38_s13 = sshll.u32 %s1278_s12, 4  ;;  %s62_s16 = sshll.u32 %s1502_s3, 4  ;;  %s39_s13 = int_to_ptr.vmem [resolvable:$true] %s38_s13  ;;  %s63_s16 = int_to_ptr.hbm [resolvable:$true] %s62_s16 }
   0x6   :  { %s1279_s17 = smov 128   ;;  %s1280_s18 = smov 8  }
   0x7   :  { %44 = dma.hbm_to_vmem [thread:$0]  %s37_s11, 1024, %s39_s13, [#allocation9], %s1279_s17, %s1279_s17, %s1280_s18  }
   0x8   :  { %s1281_s19 = smov [#allocation11]   ;;  %s88_s1 = sshll.u32 %s1504_s5, 4  ;;  %s89_s1 = int_to_ptr.hbm [resolvable:$true] %s88_s1 }
   0x9   :  { %s64_s20 = sshll.u32 %s1281_s19, 4  ;;  %s114_s24 = sshll.u32 %s1506_s7, 4  ;;  %s65_s20 = int_to_ptr.vmem [resolvable:$true] %s64_s20  ;;  %s115_s24 = int_to_ptr.hbm [resolvable:$true] %s114_s24 }
   0xa   :  { %70 = dma.hbm_to_vmem [thread:$0]  %s63_s16, 4096, %s65_s20, [#allocation12], %s1279_s17, %s1279_s17, %s1280_s18  }
   0xb   :  { %s1282_s25 = smov [#allocation14]   ;;  %s1283_s27 = smov [#allocation17]  }
   0xc   :  { %s90_s26 = sshll.u32 %s1282_s25, 4  ;;  %s116_s5 = sshll.u32 %s1283_s27, 4  ;;  %s91_s26 = int_to_ptr.vmem [resolvable:$true] %s90_s26  ;;  %s117_s5 = int_to_ptr.vmem [resolvable:$true] %s116_s5 }
   0xd   :  { %96 = dma.hbm_to_vmem [thread:$0]  %s89_s1, 1024, %s91_s26, [#allocation15], %s1279_s17, %s1279_s17, %s1280_s18  }
   0xe   :  { %s23_s30 = sshll.u32 %s1499_s0, 4  ;;  %s49_s11 = sshll.u32 %s1501_s2, 4  ;;  %s24_s30 = int_to_ptr.hbm [resolvable:$true] %s23_s30  ;;  %s50_s11 = int_to_ptr.hbm [resolvable:$true] %s49_s11 }
   0xf   :  { %122 = dma.hbm_to_vmem [thread:$0]  %s115_s24, 1024, %s117_s5, [#allocation18], %s1279_s17, %s1279_s17, %s1280_s18  }
  0x10   :  { %s1284_s12 = smov [#allocation6]   ;;  %s1285_s14 = smov [#allocation10]  }
  0x11   :  { %s25_s13 = sshll.u32 %s1284_s12, 4  ;;  %s51_s0 = sshll.u32 %s1285_s14, 4  ;;  %s26_s13 = int_to_ptr.vmem [resolvable:$true] %s25_s13  ;;  %s52_s0 = int_to_ptr.vmem [resolvable:$true] %s51_s0 }
  0x12   :  { %31 = dma.hbm_to_vmem [thread:$0]  %s24_s30, 512, %s26_s13, [#allocation7], %s1279_s17, %s1279_s17, %s1280_s18  }
  0x13   :  { %s75_s19 = sshll.u32 %s1503_s4, 4  ;;  %s101_s21 = sshll.u32 %s1505_s6, 4  ;;  %s76_s19 = int_to_ptr.hbm [resolvable:$true] %s75_s19  ;;  %s102_s21 = int_to_ptr.hbm [resolvable:$true] %s101_s21 }
  0x14   :  { %57 = dma.hbm_to_vmem [thread:$0]  %s50_s11, 4096, %s52_s0, [#allocation9], %s1279_s17, %s1279_s17, %s1280_s18  }
  0x15   :  { %s1286_s22 = smov [#allocation13]   ;;  %s1287_s3 = smov [#allocation16]  }
  0x16   :  { %s77_s1 = sshll.u32 %s1286_s22, 4  ;;  %s103_s4 = sshll.u32 %s1287_s3, 4  ;;  %s78_s1 = int_to_ptr.vmem [resolvable:$true] %s77_s1  ;;  %s104_s4 = int_to_ptr.vmem [resolvable:$true] %s103_s4 }
  0x17   :  { %83 = dma.hbm_to_vmem [thread:$0]  %s76_s19, 4096, %s78_s1, [#allocation12], %s1279_s17, %s1279_s17, %s1280_s18  }
  0x18   :  { %s127_s25 = sshll.u32 %s1507_s8, 4  ;;  %s1288_s6 = smov [#allocation19]   ;;  %s128_s25 = int_to_ptr.hbm [resolvable:$true] %s127_s25 }
  0x19   :  { %109 = dma.hbm_to_vmem [thread:$0]  %s102_s21, 256, %s104_s4, [#allocation15], %s1279_s17, %s1279_s17, %s1280_s18  }
  0x1a   :  { %s129_s26 = sshll.u32 %s1288_s6, 4  ;;  %s130_s26 = int_to_ptr.vmem [resolvable:$true] %s129_s26 }
  0x1b   :  { %135 = dma.hbm_to_vmem [thread:$0]  %s128_s25, 512, %s130_s26, [#allocation18], %s1279_s17, %s1279_s17, %s1280_s18  }
  0x1c   :  { %1268 = dma.done.wait [#allocation7], 512  }
  0x1d   :  { %1269 = vsyncadd [#allocation7], 4294966784 }
  0x1e   :  { %1270 = dma.done.wait [#allocation9], 5120  }
  0x1f   :  { %1271 = vsyncadd [#allocation9], 4294962176 }
  0x20   :  { %1272 = dma.done.wait [#allocation12], 8192  }
  0x21   :  { %1273 = vsyncadd [#allocation12], 4294959104 }
  0x22   :  { %1274 = dma.done.wait [#allocation15], 1280  }
  0x23   :  { %1275 = vsyncadd [#allocation15], 4294966016 }
  0x24   :  { %1276 = dma.done.wait [#allocation18], 1536  }
  0x25   :  { %1277 = vsyncadd [#allocation18], 4294965760  ;;  %vm172_vm0 = vcmask 130048   ;;  %v1289_v0 = vmov 0.0   ;;  %vm177_vm1 = vcmask 125952   ;;  %v187_v1 = vld [vmem:[#allocation6] sm:$0xff] }
  0x26   :  { %173 = vst.msk [vmem:[#allocation2] sm:$0xff] %vm172_vm0, %v1289_v0  ;;  %v188_v2 = vld [vmem:[#allocation6 + $0x8] sm:$0xff]  ;;  %v191_v3 = vld [vmem:[#allocation6 + $0x10] sm:$0xff]  ;;  %v192_v4 = vld [vmem:[#allocation6 + $0x18] sm:$0xff]  ;;  %s1290_s8 = smov 48   ;;  %s1291_s17 = smov 16  }
  0x27   :  { %174 = vst.msk [vmem:[#allocation2 + $0x8] sm:$0xff] %vm172_vm0, %v1289_v0  ;;  %v202_v5 = vld [vmem:[#allocation8 + $0x38] sm:$0xff]  ;;  %v201_v6 = vld [vmem:[#allocation8 + $0x30] sm:$0xff]  ;;  %v200_v7 = vld [vmem:[#allocation8 + $0x28] sm:$0xff]  ;;  %s1292_s18 = smov 32   ;;  %vm179_vm2 = vcmask 523264  }
  0x28   :  { %175 = vst.msk [vmem:[#allocation2 + $0x10] sm:$0xff] %vm172_vm0, %v1289_v0  ;;  %334 = vmatpush.msra.mxu0 %v202_v5  ;;  %384 = vmatpush.msra.mxu1 %v202_v5  ;;  %v199_v14 = vld [vmem:[#allocation8 + $0x20] sm:$0xff]  ;;  %v198_v15 = vld [vmem:[#allocation8 + $0x18] sm:$0xff]  ;;  %v197_v16 = vld [vmem:[#allocation8 + $0x10] sm:$0xff]  ;;  %vm319_vm3 = vcmask 261120   ;;  %vm321_vm4 = vcmask 392192  }
  0x29   :  { %176 = vst.msk [vmem:[#allocation2 + $0x18] sm:$0xff] %vm172_vm0, %v1289_v0  ;;  %v196_v17 = vld [vmem:[#allocation8 + $0x8] sm:$0xff]  ;;  %v195_v18 = vld [vmem:[#allocation8] sm:$0xff]  ;;  %vm182_vm5 = vcmask 519168   ;;  %v218_v33 = vld [vmem:[#allocation10 + $0x78] sm:$0xff]  ;;  %s1293_s27 = smov 64  }
  0x2a   :  { %178 = vst.msk [vmem:[#allocation2 + $0x20] sm:$0xf] %vm177_vm1, %v1289_v0  ;;  %335 = vmatpush.msra.mxu0 %v201_v6  ;;  %385 = vmatpush.msra.mxu1 %v201_v6  ;;  %v234_v34 = vld [vmem:[#allocation10 + $0xf8] sm:$0xff]  ;;  %v217_v35 = vld [vmem:[#allocation10 + $0x70] sm:$0xff]  ;;  %v216_v37 = vld [vmem:[#allocation10 + $0x68] sm:$0xff]  ;;  %vm547_vm8 = vcmask 1040384  }
  0x2b   :  { %189 = vst.msk [vmem:[#allocation2 + $0x1] sm:$0xff] %vm172_vm0, %v187_v1  ;;  %417 = vmatpush.msra.mxu2 %v218_v33  ;;  %437 = vmatpush.msra.mxu3 %v234_v34  ;;  %v233_v36 = vld [vmem:[#allocation10 + $0xf0] sm:$0xff]  ;;  %v232_v38 = vld [vmem:[#allocation10 + $0xe8] sm:$0xff]  ;;  %v215_v39 = vld [vmem:[#allocation10 + $0x60] sm:$0xff]  ;;  %vm752_vm14 = vcmask 517120  }
  0x2c   :  { %190 = vst.msk [vmem:[#allocation2 + $0x9] sm:$0xff] %vm172_vm0, %v188_v2  ;;  %336 = vmatpush.msra.mxu0 %v200_v7  ;;  %386 = vmatpush.msra.mxu1 %v200_v7  ;;  %v231_v40 = vld [vmem:[#allocation10 + $0xe0] sm:$0xff]  ;;  %v214_v41 = vld [vmem:[#allocation10 + $0x58] sm:$0xff]  ;;  %v213_v43 = vld [vmem:[#allocation10 + $0x50] sm:$0xff] }
  0x2d   :  { %193 = vst.msk [vmem:[#allocation2 + $0x13] sm:$0xff] %vm172_vm0, %v191_v3  ;;  %418 = vmatpush.msra.mxu2 %v217_v35  ;;  %438 = vmatpush.msra.mxu3 %v233_v36  ;;  %v230_v42 = vld [vmem:[#allocation10 + $0xd8] sm:$0xff]  ;;  %v229_v44 = vld [vmem:[#allocation10 + $0xd0] sm:$0xff]  ;;  %v212_v45 = vld [vmem:[#allocation10 + $0x48] sm:$0xff] }
  0x2e   :  { %194 = vst.msk [vmem:[#allocation2 + $0x1b] sm:$0xff] %vm172_vm0, %v192_v4  ;;  %337 = vmatpush.msra.mxu0 %v199_v14  ;;  %387 = vmatpush.msra.mxu1 %v199_v14  ;;  %v228_v46 = vld [vmem:[#allocation10 + $0xc8] sm:$0xff]  ;;  %v211_v47 = vld [vmem:[#allocation10 + $0x40] sm:$0xff]  ;;  %v210_v49 = vld [vmem:[#allocation10 + $0x38] sm:$0xff] }
  0x2f   :  { %180 = vst.msk [vmem:[#allocation3] sm:$0xff] %vm179_vm2, %v1289_v0  ;;  %419 = vmatpush.msra.mxu2 %v216_v37  ;;  %439 = vmatpush.msra.mxu3 %v232_v38  ;;  %v227_v48 = vld [vmem:[#allocation10 + $0xc0] sm:$0xff]  ;;  %v226_v50 = vld [vmem:[#allocation10 + $0xb8] sm:$0xff]  ;;  %v209_v51 = vld [vmem:[#allocation10 + $0x30] sm:$0xff] }
  0x30   :  { %338 = vmatpush.msra.mxu0 %v198_v15  ;;  %388 = vmatpush.msra.mxu1 %v198_v15  ;;  %181 = vst.msk [vmem:[#allocation3 + $0x8] sm:$0xff] %vm179_vm2, %v1289_v0  ;;  %v225_v52 = vld [vmem:[#allocation10 + $0xb0] sm:$0xff]  ;;  %v208_v56 = vld [vmem:[#allocation10 + $0x28] sm:$0xff]  ;;  %v207_v60 = vld [vmem:[#allocation10 + $0x20] sm:$0xff] }
  0x31   :  { %184 = vst.msk [vmem:[#allocation4] sm:$0xff] %vm179_vm2, %v1289_v0  ;;  %420 = vmatpush.msra.mxu2 %v215_v39  ;;  %440 = vmatpush.msra.mxu3 %v231_v40  ;;  %v224_v57 = vld [vmem:[#allocation10 + $0xa8] sm:$0xff]  ;;  %v223_v61 = vld [vmem:[#allocation10 + $0xa0] sm:$0xff]  ;;  %v206_v63 = vld [vmem:[#allocation10 + $0x18] sm:$0xff] }
  0x32   :  { %339 = vmatpush.msra.mxu0 %v197_v16  ;;  %389 = vmatpush.msra.mxu1 %v197_v16  ;;  %186 = vst.msk [vmem:[#allocation5] sm:$0xff] %vm179_vm2, %v1289_v0  ;;  %v205_v1 = vld [vmem:[#allocation10 + $0x10] sm:$0xff] }
  0x33   :  { %v305_v8 = vld [vmem:[#allocation2 + $0x3] ss:$2 sm:$0xff]  ;;  %v303_v12 = vld [vmem:[#allocation2 + $0x2] ss:$2 sm:$0xff]  ;;  %183 = vst.msk [vmem:[#allocation3 + $0x10] sm:$0xf] %vm182_vm5, %v1289_v0  ;;  %421 = vmatpush.msra.mxu2 %v214_v41  ;;  %441 = vmatpush.msra.mxu3 %v230_v42 }
  0x34   :  { %v301_v9 = vld [vmem:[#allocation2 + $0x1] ss:$2 sm:$0xff]  ;;  %315 = vrot.lane.b32.xlu1 %v305_v8, %s1290_s8  ;;  %340 = vmatpush.msra.mxu0 %v196_v17  ;;  %v299_v22 = vld [vmem:[#allocation2] ss:$2 sm:$0xff]  ;;  %185 = vst.msk [vmem:[#allocation4 + $0x8] sm:$0xf] %vm182_vm5, %v1289_v0 }
  0x35   :  { %307 = vrot.lane.b32.xlu0 %v301_v9, %s1291_s17  ;;  %v355_v10 = vld [vmem:[#allocation2 + $0x14] ss:$2 sm:$0xff]  ;;  %v353_v11 = vld [vmem:[#allocation2 + $0x13] ss:$2 sm:$0xff]  ;;  %390 = vmatpush.msra.mxu1 %v196_v17  ;;  %v221_v2 = vld [vmem:[#allocation10 + $0x90] sm:$0xff] }
  0x36   :  { %363 = vrot.lane.b32.xlu2 %v355_v10, %s1292_s18  ;;  %v357_v13 = vld [vmem:[#allocation2 + $0x15] ss:$2 sm:$0xff]  ;;  %341 = vmatpush.msra.mxu0 %v195_v18  ;;  %v351_v23 = vld [vmem:[#allocation2 + $0x12] ss:$2 sm:$0xff] }
  0x37   :  { %391 = vmatpush.msra.mxu1 %v195_v18  ;;  %422 = vmatpush.msra.mxu2 %v213_v43  ;;  %v222_v0 = vld [vmem:[#allocation10 + $0x98] sm:$0xff]  ;;  %v204_v9 = vld [vmem:[#allocation10 + $0x8] sm:$0xff] }
  0x38   :  { %475 = vmatpush.msrb.mxu0 %v218_v33  ;;  %442 = vmatpush.msra.mxu3 %v229_v44  ;;  %v220_v10 = vld [vmem:[#allocation10 + $0x88] sm:$0xff] }
  0x39   :  { %495 = vmatpush.msrb.mxu1 %v234_v34  ;;  %423 = vmatpush.msra.mxu2 %v212_v45  ;;  %v550_v33 = vld [vmem:[#allocation14 + $0x8] sm:$0xff]  ;;  %v549_v34 = vld [vmem:[#allocation14] sm:$0xff] }
  0x3a   :  { %476 = vmatpush.msrb.mxu0 %v217_v35  ;;  %443 = vmatpush.msra.mxu3 %v228_v46 }
  0x3b   :  { %496 = vmatpush.msrb.mxu1 %v233_v36  ;;  %424 = vmatpush.msra.mxu2 %v211_v47 }
  0x3c   :  { %359 = vrot.lane.b32.xlu1 %v353_v11, %s1291_s17  ;;  %477 = vmatpush.msrb.mxu0 %v216_v37  ;;  %v203_v11 = vld [vmem:[#allocation10] sm:$0xff] }
  0x3d   :  { %311 = vrot.lane.b32.xlu0 %v303_v12, %s1292_s18  ;;  %497 = vmatpush.msrb.mxu1 %v232_v38  ;;  %v219_v12 = vld [vmem:[#allocation10 + $0x80] sm:$0xff] }
  0x3e   :  { %367 = vrot.lane.b32.xlu2 %v357_v13, %s1290_s8  ;;  %478 = vmatpush.msrb.mxu0 %v215_v39 }
  0x3f   :  { %498 = vmatpush.msrb.mxu1 %v231_v40  ;;  %444 = vmatpush.msra.mxu3 %v227_v48 }
  0x40   :  { %479 = vmatpush.msrb.mxu0 %v214_v41  ;;  %425 = vmatpush.msra.mxu2 %v210_v49 }
  0x41   :  { %499 = vmatpush.msrb.mxu1 %v230_v42  ;;  %445 = vmatpush.msra.mxu3 %v226_v50 }
  0x42   :  { %480 = vmatpush.msrb.mxu0 %v213_v43  ;;  %426 = vmatpush.msra.mxu2 %v209_v51 }
  0x43   :  { %500 = vmatpush.msrb.mxu1 %v229_v44  ;;  %446 = vmatpush.msra.mxu3 %v225_v52 }
  0x44   :  { %481 = vmatpush.msrb.mxu0 %v212_v45  ;;  %427 = vmatpush.msra.mxu2 %v208_v56 }
  0x45   :  { %501 = vmatpush.msrb.mxu1 %v228_v46  ;;  %447 = vmatpush.msra.mxu3 %v224_v57 }
  0x46   :  { %482 = vmatpush.msrb.mxu0 %v211_v47  ;;  %428 = vmatpush.msra.mxu2 %v207_v60 }
  0x47   :  { %502 = vmatpush.msrb.mxu1 %v227_v48  ;;  %448 = vmatpush.msra.mxu3 %v223_v61 }
  0x48   :  { %483 = vmatpush.msrb.mxu0 %v210_v49  ;;  %429 = vmatpush.msra.mxu2 %v206_v63 }
  0x49   :  { %503 = vmatpush.msrb.mxu1 %v226_v50  ;;  %449 = vmatpush.msra.mxu3 %v222_v0 }
  0x4a   :  { %484 = vmatpush.msrb.mxu0 %v209_v51  ;;  %430 = vmatpush.msra.mxu2 %v205_v1 }
  0x4b   :  { %504 = vmatpush.msrb.mxu1 %v225_v52  ;;  %450 = vmatpush.msra.mxu3 %v221_v2 }
  0x4c   :  { %485 = vmatpush.msrb.mxu0 %v208_v56  ;;  %431 = vmatpush.msra.mxu2 %v204_v9 }
  0x4d   :  { %505 = vmatpush.msrb.mxu1 %v224_v57  ;;  %451 = vmatpush.msra.mxu3 %v220_v10 }
  0x4e   :  { %486 = vmatpush.msrb.mxu0 %v207_v60  ;;  %432 = vmatpush.msra.mxu2 %v203_v11 }
  0x4f   :  { %506 = vmatpush.msrb.mxu1 %v223_v61  ;;  %452 = vmatpush.msra.mxu3 %v219_v12 }
  0x50   :  { %487 = vmatpush.msrb.mxu0 %v206_v63 }
  0x51   :  { %507 = vmatpush.msrb.mxu1 %v222_v0 }
  0x52   :  { %488 = vmatpush.msrb.mxu0 %v205_v1 }
  0x53   :  { %508 = vmatpush.msrb.mxu1 %v221_v2 }
  0x54   :  { %489 = vmatpush.msrb.mxu0 %v204_v9 }
  0x55   :  { %509 = vmatpush.msrb.mxu1 %v220_v10  ;;  %v599_v10 = vld [vmem:[#allocation16 + $0x8] sm:$0xff] }
  0x56   :  { %490 = vmatpush.msrb.mxu0 %v203_v11  ;;  %v598_v11 = vld [vmem:[#allocation16] sm:$0xff]  ;;  %617 = vmatpush.msrb.mxu3 %v599_v10 }
  0x57   :  { %510 = vmatpush.msrb.mxu1 %v219_v12  ;;  %v251_v10 = vld [vmem:[#allocation11 + $0x80] sm:$0xff] }
  0x58   :  { %618 = vmatpush.msrb.mxu3 %v598_v11 }
  0x90   :  { %v364_v19 = vpop.permute.xlu2 %363 }
  0x98   :  { %v368_v24 = vpop.permute.xlu2 %367 }
  0xa6   :  { %v316_v20 = vpop.permute.xlu1 %315 }
  0xa7   :  { %v308_v21 = vpop.permute.xlu0 %307 }
  0xa8   :  { %v318_v25 = vsel %vm172_vm0, %v299_v22, %v308_v21 }
  0xae   :  { %v360_v26 = vpop.permute.xlu1 %359 }
  0xaf   :  { %v312_v27 = vpop.permute.xlu0 %311  ;;  %v370_v28 = vsel %vm172_vm0, %v351_v23, %v360_v26 }
  0xb0   :  { %v320_v29 = vsel %vm319_vm3, %v318_v25, %v312_v27  ;;  %v371_v31 = vsel %vm319_vm3, %v370_v28, %v364_v19  ;;  %v556_v27 = vld [vmem:[#allocation14 + $0x38] sm:$0xff]  ;;  %v555_v28 = vld [vmem:[#allocation14 + $0x30] sm:$0xff] }
  0xb1   :  { %v322_v30 = vsel %vm321_vm4, %v320_v29, %v316_v20  ;;  %v372_v32 = vsel %vm321_vm4, %v371_v31, %v368_v24  ;;  %568 = vmatpush.msrb.mxu2 %v556_v27  ;;  %v554_v29 = vld [vmem:[#allocation14 + $0x28] sm:$0xff]  ;;  %v552_v31 = vld [vmem:[#allocation14 + $0x18] sm:$0xff] }
  0xb2   :  { %996 = vmatmul.msk.f32.vlgmr.msra.gmra.mxu0 %vm179_vm2, %v322_v30  ;;  %997 = vmatmul.msk.f32.vlgmr.msra.gmra.mxu1 %vm179_vm2, %v372_v32  ;;  %v553_v30 = vld [vmem:[#allocation14 + $0x20] sm:$0xff]  ;;  %v551_v32 = vld [vmem:[#allocation14 + $0x10] sm:$0xff]  ;;  %v266_v27 = vld [vmem:[#allocation11 + $0xf8] sm:$0xff] }
  0xb3   :  { %569 = vmatpush.msrb.mxu2 %v555_v28  ;;  %v249_v28 = vld [vmem:[#allocation11 + $0x70] sm:$0xff]  ;;  %674 = vmatpush.msra.mxu0 %v266_v27 }
  0xb5   :  { %570 = vmatpush.msrb.mxu2 %v554_v29  ;;  %v265_v29 = vld [vmem:[#allocation11 + $0xf0] sm:$0xff] }
  0xb6   :  { %675 = vmatpush.msra.mxu0 %v265_v29 }
  0xb7   :  { %571 = vmatpush.msrb.mxu2 %v553_v30  ;;  %v248_v30 = vld [vmem:[#allocation11 + $0x68] sm:$0xff] }
  0xb9   :  { %572 = vmatpush.msrb.mxu2 %v552_v31  ;;  %v264_v31 = vld [vmem:[#allocation11 + $0xe8] sm:$0xff] }
  0xba   :  { %676 = vmatpush.msra.mxu0 %v264_v31 }
  0xbb   :  { %573 = vmatpush.msrb.mxu2 %v551_v32  ;;  %v247_v32 = vld [vmem:[#allocation11 + $0x60] sm:$0xff] }
  0xbd   :  { %574 = vmatpush.msrb.mxu2 %v550_v33  ;;  %v263_v33 = vld [vmem:[#allocation11 + $0xe0] sm:$0xff] }
  0xbe   :  { %677 = vmatpush.msra.mxu0 %v263_v33 }
  0xbf   :  { %575 = vmatpush.msrb.mxu2 %v549_v34  ;;  %v246_v34 = vld [vmem:[#allocation11 + $0x58] sm:$0xff] }
 0x12f   :  { %v343_v53 = vpop.f32.mrf.mxu0  ;;  %v393_v55 = vpop.f32.mrf.mxu1 }
 0x130   :  { %vm346_vm6 = vcmp.ge.f32.partialorder %v343_v53, 0.0  ;;  %v347_v54 = vmul.f32 0.2, %v343_v53  ;;  %vm396_vm7 = vcmp.ge.f32.partialorder %v393_v55, 0.0  ;;  %v397_v58 = vmul.f32 0.2, %v393_v55 }
 0x132   :  { %v348_v59 = vsel %vm346_vm6, %v343_v53, %v347_v54  ;;  %v398_v62 = vsel %vm396_vm7, %v393_v55, %v397_v58 }
 0x133   :  { %349 = vst.msk [vmem:[#allocation3 + $0x1] sm:$0xff] %vm179_vm2, %v348_v59 }
 0x134   :  { %399 = vst.msk [vmem:[#allocation3 + $0xb] sm:$0xff] %vm179_vm2, %v398_v62 }
 0x13a   :  { %v402_v3 = vld [vmem:[#allocation3 + $0x1] ss:$2 sm:$0xf]  ;;  %v400_v19 = vld [vmem:[#allocation3] ss:$2 sm:$0xf] }
 0x13b   :  { %v406_v4 = vld [vmem:[#allocation3 + $0x3] ss:$2 sm:$0xf]  ;;  %v460_v6 = vld [vmem:[#allocation3 + $0xb] ss:$2 sm:$0xf] }
 0x13c   :  { %v1018_v5 = vpack.i.bf16 %v406_v4, %v402_v3  ;;  %v464_v7 = vld [vmem:[#allocation3 + $0xd] ss:$2 sm:$0xf]  ;;  %v404_v20 = vld [vmem:[#allocation3 + $0x2] ss:$2 sm:$0xf] }
 0x13d   :  { %v1023_v8 = vpack.i.bf16 %v464_v7, %v460_v6  ;;  %v458_v23 = vld [vmem:[#allocation3 + $0xa] ss:$2 sm:$0xf] }
 0x13e   :  { %1019 = vrot.lane.b32.xlu0 %v1018_v5, %s1293_s27  ;;  %v462_v24 = vld [vmem:[#allocation3 + $0xc] ss:$2 sm:$0xf] }
 0x13f   :  { %1024 = vrot.lane.b32.xlu1 %v1023_v8, %s1293_s27 }
 0x1b0   :  { %v1020_v13 = vpop.permute.xlu0 %1019 }
 0x1b1   :  { %v1022_v14 = vunpack.i.h.bf16 %v1020_v13  ;;  %v1021_v15 = vunpack.i.l.bf16 %v1020_v13  ;;  %v1025_v16 = vpop.permute.xlu1 %1024 }
 0x1b2   :  { %v1027_v17 = vunpack.i.h.bf16 %v1025_v16  ;;  %v1026_v18 = vunpack.i.l.bf16 %v1025_v16 }
 0x1b3   :  { %v415_v21 = vsel %vm179_vm2, %v400_v19, %v1021_v15  ;;  %v416_v22 = vsel %vm179_vm2, %v404_v20, %v1022_v14 }
 0x1b4   :  { %433 = vmatmul.f32.vlgmr.msra.gmra.mxu2 %v415_v21  ;;  %453 = vmatmul.f32.vlgmr.msra.gmra.mxu3 %v416_v22  ;;  %v473_v25 = vsel %vm179_vm2, %v458_v23, %v1026_v18  ;;  %v474_v26 = vsel %vm179_vm2, %v462_v24, %v1027_v17 }
 0x1b5   :  { %491 = vmatmul.f32.vlgmr.msrb.gmra.mxu0 %v473_v25  ;;  %511 = vmatmul.f32.vlgmr.msrb.gmra.mxu1 %v474_v26  ;;  %v250_v26 = vld [vmem:[#allocation11 + $0x78] sm:$0xff] }
 0x1b6   :  { %654 = vmatpush.msra.mxu3 %v250_v26  ;;  %732 = vmatpush.msra.mxu2 %v266_v27  ;;  %v791_v27 = vld [vmem:[#allocation17 + $0x28] sm:$0xff] }
 0x1b7   :  { %712 = vmatpush.msra.mxu1 %v250_v26  ;;  %v792_v26 = vld [vmem:[#allocation17 + $0x30] sm:$0xff] }
 0x1b8   :  { %655 = vmatpush.msra.mxu3 %v249_v28  ;;  %733 = vmatpush.msra.mxu2 %v265_v29  ;;  %v789_v29 = vld [vmem:[#allocation17 + $0x18] sm:$0xff] }
 0x1b9   :  { %713 = vmatpush.msra.mxu1 %v249_v28  ;;  %v790_v28 = vld [vmem:[#allocation17 + $0x20] sm:$0xff] }
 0x1ba   :  { %656 = vmatpush.msra.mxu3 %v248_v30  ;;  %734 = vmatpush.msra.mxu2 %v264_v31  ;;  %v787_v31 = vld [vmem:[#allocation17 + $0x8] sm:$0xff] }
 0x1bb   :  { %714 = vmatpush.msra.mxu1 %v248_v30  ;;  %v788_v30 = vld [vmem:[#allocation17 + $0x10] sm:$0xff] }
 0x1bc   :  { %657 = vmatpush.msra.mxu3 %v247_v32  ;;  %735 = vmatpush.msra.mxu2 %v263_v33 }
 0x1bd   :  { %715 = vmatpush.msra.mxu1 %v247_v32  ;;  %v786_v32 = vld [vmem:[#allocation17] sm:$0xff] }
 0x1be   :  { %658 = vmatpush.msra.mxu3 %v246_v34 }
 0x1bf   :  { %716 = vmatpush.msra.mxu1 %v246_v34 }
 0x232   :  { %v492_v35 = vpop.f32.mrf.mxu0  ;;  %v512_v36 = vpop.f32.mrf.mxu1 }
 0x233   :  { %v1437_v37 = vadd.f32 %v512_v36, %v492_v35  ;;  %v262_v35 = vld [vmem:[#allocation11 + $0xd8] sm:$0xff]  ;;  %v245_v36 = vld [vmem:[#allocation11 + $0x50] sm:$0xff] }
 0x234   :  { %736 = vmatpush.msra.mxu2 %v262_v35  ;;  %678 = vmatpush.msra.mxu0 %v262_v35 }
 0x235   :  { %v530_v38 = vsel %vm182_vm5, %v1437_v37, 0.0  ;;  %v538_v39 = vmul.f32 %v1437_v37, %v1437_v37  ;;  %659 = vmatpush.msra.mxu3 %v245_v36  ;;  %717 = vmatpush.msra.mxu1 %v245_v36 }
 0x236   :  { %v531_v40 = vrot.slane %v530_v38, 4 }
 0x237   :  { %v539_v41 = vsel %vm182_vm5, %v538_v39, 0.0  ;;  %v434_v42 = vpop.f32.mrf.mxu2  ;;  %v454_v43 = vpop.f32.mrf.mxu3  ;;  %v244_v39 = vld [vmem:[#allocation11 + $0x48] sm:$0xff] }
 0x238   :  { %v532_v44 = vadd.f32 %v531_v40, %v530_v38  ;;  %v540_v45 = vrot.slane %v539_v41, 4  ;;  %v1444_v46 = vadd.f32 %v454_v43, %v434_v42  ;;  %v261_v38 = vld [vmem:[#allocation11 + $0xd0] sm:$0xff]  ;;  %v260_v40 = vld [vmem:[#allocation11 + $0xc8] sm:$0xff]  ;;  %v243_v43 = vld [vmem:[#allocation11 + $0x40] sm:$0xff]  ;;  %660 = vmatpush.msra.mxu3 %v244_v39  ;;  %718 = vmatpush.msra.mxu1 %v244_v39 }
 0x239   :  { %737 = vmatpush.msra.mxu2 %v261_v38  ;;  %679 = vmatpush.msra.mxu0 %v261_v38 }
 0x23a   :  { %v541_v47 = vadd.f32 %v540_v45, %v539_v41  ;;  %v515_v48 = vsel %vm182_vm5, %v1444_v46, 0.0  ;;  %v522_v49 = vmul.f32 %v1444_v46, %v1444_v46  ;;  %v533_v50 = vrot.slane %v532_v44, 2  ;;  %661 = vmatpush.msra.mxu3 %v243_v43  ;;  %719 = vmatpush.msra.mxu1 %v243_v43 }
 0x23b   :  { %v516_v51 = vrot.slane %v515_v48, 4  ;;  %738 = vmatpush.msra.mxu2 %v260_v40  ;;  %680 = vmatpush.msra.mxu0 %v260_v40 }
 0x23c   :  { %v542_v52 = vrot.slane %v541_v47, 2  ;;  %v523_v53 = vsel %vm182_vm5, %v522_v49, 0.0  ;;  %v534_v56 = vadd.f32 %v533_v50, %v532_v44  ;;  %v259_v44 = vld [vmem:[#allocation11 + $0xc0] sm:$0xff]  ;;  %v242_v49 = vld [vmem:[#allocation11 + $0x38] sm:$0xff] }
 0x23d   :  { %v517_v54 = vadd.f32 %v516_v51, %v515_v48  ;;  %v524_v55 = vrot.slane %v523_v53, 4  ;;  %v258_v50 = vld [vmem:[#allocation11 + $0xb8] sm:$0xff]  ;;  %739 = vmatpush.msra.mxu2 %v259_v44  ;;  %681 = vmatpush.msra.mxu0 %v259_v44 }
 0x23e   :  { %v543_v57 = vadd.f32 %v542_v52, %v541_v47  ;;  %v535_v62 = vrot.slane %v534_v56, 1  ;;  %662 = vmatpush.msra.mxu3 %v242_v49  ;;  %720 = vmatpush.msra.mxu1 %v242_v49 }
 0x23f   :  { %v518_v58 = vrot.slane %v517_v54, 2  ;;  %v525_v59 = vadd.f32 %v524_v55, %v523_v53  ;;  %v241_v53 = vld [vmem:[#allocation11 + $0x30] sm:$0xff]  ;;  %740 = vmatpush.msra.mxu2 %v258_v50  ;;  %v240_v55 = vld [vmem:[#allocation11 + $0x28] sm:$0xff]  ;;  %682 = vmatpush.msra.mxu0 %v258_v50 }
 0x240   :  { %v544_v1 = vrot.slane %v543_v57, 1  ;;  %v536_v5 = vadd.f32 %v535_v62, %v534_v56  ;;  %v256_v56 = vld [vmem:[#allocation11 + $0xa8] sm:$0xff]  ;;  %663 = vmatpush.msra.mxu3 %v241_v53  ;;  %721 = vmatpush.msra.mxu1 %v241_v53  ;;  %v254_v62 = vld [vmem:[#allocation11 + $0x98] sm:$0xff] }
 0x241   :  { %v519_v60 = vadd.f32 %v518_v58, %v517_v54  ;;  %v526_v61 = vrot.slane %v525_v59, 2  ;;  %v257_v54 = vld [vmem:[#allocation11 + $0xb0] sm:$0xff] }
 0x242   :  { %v545_v6 = vadd.f32 %v544_v1, %v543_v57  ;;  %741 = vmatpush.msra.mxu2 %v257_v54  ;;  %683 = vmatpush.msra.mxu0 %v257_v54 }
 0x243   :  { %v520_v63 = vrot.slane %v519_v60, 1  ;;  %v527_v0 = vadd.f32 %v526_v61, %v525_v59  ;;  %v239_v59 = vld [vmem:[#allocation11 + $0x20] sm:$0xff]  ;;  %664 = vmatpush.msra.mxu3 %v240_v55  ;;  %v238_v61 = vld [vmem:[#allocation11 + $0x18] sm:$0xff]  ;;  %722 = vmatpush.msra.mxu1 %v240_v55 }
 0x244   :  { %742 = vmatpush.msra.mxu2 %v256_v56  ;;  %684 = vmatpush.msra.mxu0 %v256_v56 }
 0x245   :  { %v521_v2 = vadd.f32 %v520_v63, %v519_v60  ;;  %v528_v3 = vrot.slane %v527_v0, 1  ;;  %v255_v60 = vld [vmem:[#allocation11 + $0xa0] sm:$0xff]  ;;  %665 = vmatpush.msra.mxu3 %v239_v59  ;;  %v237_v63 = vld [vmem:[#allocation11 + $0x10] sm:$0xff]  ;;  %723 = vmatpush.msra.mxu1 %v239_v59 }
 0x246   :  { %743 = vmatpush.msra.mxu2 %v255_v60  ;;  %685 = vmatpush.msra.mxu0 %v255_v60 }
 0x247   :  { %v529_v4 = vadd.f32 %v528_v3, %v527_v0  ;;  %v537_v7 = vadd.f32 %v536_v5, %v521_v2  ;;  %v253_v0 = vld [vmem:[#allocation11 + $0x90] sm:$0xff]  ;;  %666 = vmatpush.msra.mxu3 %v238_v61  ;;  %724 = vmatpush.msra.mxu1 %v238_v61 }
 0x248   :  { %744 = vmatpush.msra.mxu2 %v254_v62  ;;  %686 = vmatpush.msra.mxu0 %v254_v62 }
 0x249   :  { %v546_v8 = vadd.f32 %v545_v6, %v529_v4  ;;  %667 = vmatpush.msra.mxu3 %v237_v63  ;;  %725 = vmatpush.msra.mxu1 %v237_v63 }
 0x24a   :  { %745 = vmatpush.msra.mxu2 %v253_v0  ;;  %687 = vmatpush.msra.mxu0 %v253_v0 }
 0x24b   :  { %v548_v9 = vsel %vm547_vm8, %v537_v7, %v546_v8  ;;  %v236_v7 = vld [vmem:[#allocation11 + $0x8] sm:$0xff] }
 0x24c   :  { %998 = vmatmul.msk.f32.vlgmr.msrb.gmra.mxu2 %vm179_vm2, %v548_v9  ;;  %v252_v8 = vld [vmem:[#allocation11 + $0x88] sm:$0xff]  ;;  %v235_v9 = vld [vmem:[#allocation11] sm:$0xff]  ;;  %668 = vmatpush.msra.mxu3 %v236_v7 }
 0x24d   :  { %746 = vmatpush.msra.mxu2 %v252_v8  ;;  %688 = vmatpush.msra.mxu0 %v252_v8  ;;  %v838_v8 = vld [vmem:[#allocation19 + $0x18] sm:$0xff] }
 0x24e   :  { %726 = vmatpush.msra.mxu1 %v236_v7  ;;  %669 = vmatpush.msra.mxu3 %v235_v9 }
 0x24f   :  { %747 = vmatpush.msra.mxu2 %v251_v10  ;;  %689 = vmatpush.msra.mxu0 %v251_v10  ;;  %v836_v10 = vld [vmem:[#allocation19 + $0x8] sm:$0xff] }
 0x250   :  { %727 = vmatpush.msra.mxu1 %v235_v9  ;;  %v837_v9 = vld [vmem:[#allocation19 + $0x10] sm:$0xff] }
 0x251   :  { %854 = vmatpush.msrb.mxu0 %v838_v8 }
 0x253   :  { %855 = vmatpush.msrb.mxu0 %v837_v9 }
 0x255   :  { %856 = vmatpush.msrb.mxu0 %v836_v10 }
 0x2cf   :  { %v577_v12 = vpop.f32.mrf.mxu2 }
 0x2d0   :  { %v580_v13 = vmul.f32 0.03125, %v577_v12 }
 0x2d2   :  { %v581_v14 = vmul.f32 %v580_v13, %v580_v13 }
 0x2d4   :  { %v583_v15 = vrot.slane %v581_v14, 7 }
 0x2d6   :  { %v585_v16 = vsub.f32 %v580_v13, %v583_v15 }
 0x2d8   :  { %v586_v17 = vadd.f32 1e-05, %v585_v16 }
 0x2da   :  { %1048 = vrsqrt.f32 %v586_v17  ;;  %vm593_vm10 = vweird.f32 %v586_v17 }
 0x2e0   :  { %v1049_v18 = vpop.eup %1048 }
 0x2e1   :  { %v588_v19 = vmul.f32 %v1049_v18, %v586_v17  ;;  %vm594_vm9 = vweird.f32 %v1049_v18 }
 0x2e2   :  { %vm595_vm11 = vmor %vm593_vm10, %vm594_vm9 }
 0x2e3   :  { %v589_v20 = vmul.f32 %v1049_v18, %v588_v19 }
 0x2e5   :  { %v590_v21 = vmul.f32 0.5, %v589_v20 }
 0x2e7   :  { %v591_v22 = vsub.f32 1.5, %v590_v21 }
 0x2e9   :  { %v592_v23 = vmul.f32 %v1049_v18, %v591_v22 }
 0x2eb   :  { %v596_v24 = vsel %vm595_vm11, %v1049_v18, %v592_v23 }
 0x2ec   :  { %v597_v25 = vsel %vm547_vm8, %v580_v13, %v596_v24 }
 0x2ed   :  { %999 = vmatmul.msk.f32.vlgmr.msrb.gmra.mxu3 %vm172_vm0, %v597_v25  ;;  %v793_v25 = vld [vmem:[#allocation17 + $0x38] sm:$0xff] }
 0x2ee   :  { %805 = vmatpush.msrb.mxu3 %v793_v25 }
 0x2f0   :  { %806 = vmatpush.msrb.mxu3 %v792_v26 }
 0x2f2   :  { %807 = vmatpush.msrb.mxu3 %v791_v27 }
 0x2f4   :  { %808 = vmatpush.msrb.mxu3 %v790_v28 }
 0x2f6   :  { %809 = vmatpush.msrb.mxu3 %v789_v29 }
 0x2f8   :  { %810 = vmatpush.msrb.mxu3 %v788_v30 }
 0x2fa   :  { %811 = vmatpush.msrb.mxu3 %v787_v31 }
 0x2fc   :  { %812 = vmatpush.msrb.mxu3 %v786_v32 }
 0x370   :  { %v620_v41 = vpop.f32.mrf.mxu3 }
 0x371   :  { %v623_v42 = vperm.slane %v620_v41, 0  ;;  %v625_v47 = vperm.slane %v620_v41, 1 }
 0x373   :  { %v624_v45 = vsub.f32 %v1444_v46, %v623_v42  ;;  %v627_v48 = vsub.f32 %v1437_v37, %v623_v42 }
 0x375   :  { %v626_v51 = vmul.f32 %v625_v47, %v624_v45  ;;  %v628_v52 = vmul.f32 %v627_v48, %v625_v47 }
 0x377   :  { %vm629_vm12 = vcmp.ge.f32.partialorder %v626_v51, 0.0  ;;  %v630_v46 = vmul.f32 0.2, %v626_v51  ;;  %vm633_vm13 = vcmp.ge.f32.partialorder %v628_v52, 0.0  ;;  %v634_v37 = vmul.f32 0.2, %v628_v52 }
 0x379   :  { %v631_v57 = vsel %vm629_vm12, %v626_v51, %v630_v46  ;;  %v635_v58 = vsel %vm633_vm13, %v628_v52, %v634_v37 }
 0x37a   :  { %632 = vst.msk [vmem:[#allocation4 + $0x1] sm:$0xf] %vm182_vm5, %v631_v57 }
 0x37b   :  { %636 = vst.msk [vmem:[#allocation4 + $0x7] sm:$0xf] %vm182_vm5, %v635_v58  ;;  %vm930_vm5 = vcmask 0  }
 0x381   :  { %v643_v1 = vld [vmem:[#allocation4 + $0x3] ss:$2 sm:$0x3]  ;;  %v637_v14 = vld [vmem:[#allocation4] ss:$2 sm:$0x3] }
 0x382   :  { %v639_v2 = vld [vmem:[#allocation4 + $0x1] ss:$2 sm:$0x3]  ;;  %v697_v3 = vld [vmem:[#allocation4 + $0x7] ss:$2 sm:$0x3] }
 0x383   :  { %v701_v4 = vld [vmem:[#allocation4 + $0x9] ss:$2 sm:$0x3]  ;;  %v1033_v5 = vpack.i.bf16 %v697_v3, %v643_v1  ;;  %v699_v15 = vld [vmem:[#allocation4 + $0x8] ss:$2 sm:$0x3] }
 0x384   :  { %v1028_v6 = vpack.i.bf16 %v701_v4, %v639_v2  ;;  %v641_v21 = vld [vmem:[#allocation4 + $0x2] ss:$2 sm:$0x3]  ;;  %v695_v22 = vld [vmem:[#allocation4 + $0x6] ss:$2 sm:$0x3] }
 0x385   :  { %1034 = vrot.lane.b32.xlu0 %v1033_v5, %s1293_s27 }
 0x386   :  { %1029 = vrot.lane.b32.xlu2 %v1028_v6, %s1293_s27 }
 0x3e0   :  { %v1030_v11 = vpop.permute.xlu2 %1029 }
 0x3e1   :  { %v1032_v12 = vunpack.i.h.bf16 %v1030_v11  ;;  %v1031_v13 = vunpack.i.l.bf16 %v1030_v11  ;;  %v835_v11 = vld [vmem:[#allocation19] sm:$0xff] }
 0x3e2   :  { %857 = vmatpush.msrb.mxu0 %v835_v11 }
 0x3e3   :  { %v652_v16 = vsel %vm179_vm2, %v637_v14, %v1031_v13  ;;  %v711_v17 = vsel %vm179_vm2, %v699_v15, %v1032_v12  ;;  %v879_v12 = vld [vmem:[#allocation5 + $0x3] sm:$0x1]  ;;  %v935_v13 = vld [vmem:[#allocation5 + $0x7] sm:$0x1] }
 0x3e4   :  { %670 = vmatmul.f32.vlgmr.msra.gmra.mxu3 %v652_v16  ;;  %748 = vmatmul.f32.vlgmr.msra.gmra.mxu2 %v711_v17  ;;  %v298_v14 = vld [vmem:[#allocation13 + $0xf8] sm:$0xff]  ;;  %v1038_v15 = vpack.i.bf16 %v935_v13, %v879_v12  ;;  %v297_v16 = vld [vmem:[#allocation13 + $0xf0] sm:$0xff] }
 0x3e5   :  { %910 = vmatpush.msrb.mxu2 %v298_v14  ;;  %966 = vmatpush.msra.mxu3 %v298_v14 }
 0x3e6   :  { %1039 = vrot.lane.b32.xlu1 %v1038_v15, %s1293_s27 }
 0x3e7   :  { %911 = vmatpush.msrb.mxu2 %v297_v16  ;;  %967 = vmatpush.msra.mxu3 %v297_v16  ;;  %v268_v16 = vld [vmem:[#allocation13 + $0x8] sm:$0xff] }
 0x3f7   :  { %v1035_v18 = vpop.permute.xlu0 %1034 }
 0x3f8   :  { %v1037_v19 = vunpack.i.h.bf16 %v1035_v18  ;;  %v1036_v20 = vunpack.i.l.bf16 %v1035_v18  ;;  %v296_v18 = vld [vmem:[#allocation13 + $0xe8] sm:$0xff] }
 0x3f9   :  { %912 = vmatpush.msrb.mxu2 %v296_v18  ;;  %968 = vmatpush.msra.mxu3 %v296_v18 }
 0x3fa   :  { %v653_v23 = vsel %vm179_vm2, %v641_v21, %v1036_v20  ;;  %v710_v24 = vsel %vm179_vm2, %v695_v22, %v1037_v19  ;;  %v295_v20 = vld [vmem:[#allocation13 + $0xe0] sm:$0xff]  ;;  %v294_v22 = vld [vmem:[#allocation13 + $0xd8] sm:$0xff] }
 0x3fb   :  { %690 = vmatmul.f32.vlgmr.msra.gmra.mxu0 %v653_v23  ;;  %728 = vmatmul.f32.vlgmr.msra.gmra.mxu1 %v710_v24  ;;  %v293_v24 = vld [vmem:[#allocation13 + $0xd0] sm:$0xff] }
 0x3fc   :  { %913 = vmatpush.msrb.mxu2 %v295_v20  ;;  %969 = vmatpush.msra.mxu3 %v295_v20  ;;  %v932_v20 = vld [vmem:[#allocation5 + $0x4] sm:$0x1] }
 0x3fe   :  { %914 = vmatpush.msrb.mxu2 %v294_v22  ;;  %970 = vmatpush.msra.mxu3 %v294_v22 }
 0x400   :  { %915 = vmatpush.msrb.mxu2 %v293_v24  ;;  %971 = vmatpush.msra.mxu3 %v293_v24 }
 0x467   :  { %v671_v33 = vpop.f32.mrf.mxu3  ;;  %v749_v34 = vpop.f32.mrf.mxu2 }
 0x478   :  { %v691_v35 = vpop.f32.mrf.mxu0  ;;  %v729_v36 = vpop.f32.mrf.mxu1 }
 0x479   :  { %v1465_v38 = vadd.f32 %v691_v35, %v671_v33  ;;  %v1467_v39 = vadd.f32 %v749_v34, %v729_v36  ;;  %v292_v35 = vld [vmem:[#allocation13 + $0xc8] sm:$0xff]  ;;  %v291_v36 = vld [vmem:[#allocation13 + $0xc0] sm:$0xff] }
 0x47a   :  { %916 = vmatpush.msrb.mxu2 %v292_v35  ;;  %972 = vmatpush.msra.mxu3 %v292_v35 }
 0x47b   :  { %v753_v40 = vsel %vm752_vm14, %v1465_v38, 0.0  ;;  %v760_v41 = vmul.f32 %v1465_v38, %v1465_v38  ;;  %v768_v42 = vsel %vm752_vm14, %v1467_v39, 0.0  ;;  %v776_v43 = vmul.f32 %v1467_v39, %v1467_v39 }
 0x47c   :  { %v754_v44 = vrot.slane %v753_v40, 4  ;;  %v769_v45 = vrot.slane %v768_v42, 4  ;;  %917 = vmatpush.msrb.mxu2 %v291_v36  ;;  %973 = vmatpush.msra.mxu3 %v291_v36 }
 0x47d   :  { %v761_v47 = vsel %vm752_vm14, %v760_v41, 0.0  ;;  %v777_v48 = vsel %vm752_vm14, %v776_v43, 0.0  ;;  %v289_v41 = vld [vmem:[#allocation13 + $0xb0] sm:$0xff]  ;;  %v287_v43 = vld [vmem:[#allocation13 + $0xa0] sm:$0xff] }
 0x47e   :  { %v755_v49 = vadd.f32 %v754_v44, %v753_v40  ;;  %v762_v50 = vrot.slane %v761_v47, 4  ;;  %v770_v51 = vadd.f32 %v769_v45, %v768_v42  ;;  %v778_v52 = vrot.slane %v777_v48, 4  ;;  %v290_v40 = vld [vmem:[#allocation13 + $0xb8] sm:$0xff]  ;;  %v288_v42 = vld [vmem:[#allocation13 + $0xa8] sm:$0xff]  ;;  %v285_v45 = vld [vmem:[#allocation13 + $0x90] sm:$0xff] }
 0x47f   :  { %918 = vmatpush.msrb.mxu2 %v290_v40  ;;  %974 = vmatpush.msra.mxu3 %v290_v40  ;;  %v286_v44 = vld [vmem:[#allocation13 + $0x98] sm:$0xff] }
 0x480   :  { %v756_v53 = vrot.slane %v755_v49, 2  ;;  %v763_v54 = vadd.f32 %v762_v50, %v761_v47  ;;  %v771_v55 = vrot.slane %v770_v51, 2  ;;  %v779_v56 = vadd.f32 %v778_v52, %v777_v48  ;;  %v284_v47 = vld [vmem:[#allocation13 + $0x88] sm:$0xff]  ;;  %v283_v48 = vld [vmem:[#allocation13 + $0x80] sm:$0xff]  ;;  %v281_v50 = vld [vmem:[#allocation13 + $0x70] sm:$0xff] }
 0x481   :  { %919 = vmatpush.msrb.mxu2 %v289_v41  ;;  %975 = vmatpush.msra.mxu3 %v289_v41  ;;  %v279_v52 = vld [vmem:[#allocation13 + $0x60] sm:$0xff] }
 0x482   :  { %v757_v46 = vadd.f32 %v756_v53, %v755_v49  ;;  %v764_v37 = vrot.slane %v763_v54, 2  ;;  %v772_v57 = vadd.f32 %v771_v55, %v770_v51  ;;  %v780_v58 = vrot.slane %v779_v56, 2  ;;  %v282_v49 = vld [vmem:[#allocation13 + $0x78] sm:$0xff]  ;;  %v280_v51 = vld [vmem:[#allocation13 + $0x68] sm:$0xff] }
 0x483   :  { %920 = vmatpush.msrb.mxu2 %v288_v42  ;;  %976 = vmatpush.msra.mxu3 %v288_v42  ;;  %v278_v53 = vld [vmem:[#allocation13 + $0x58] sm:$0xff]  ;;  %v276_v55 = vld [vmem:[#allocation13 + $0x48] sm:$0xff] }
 0x484   :  { %v758_v59 = vrot.slane %v757_v46, 1  ;;  %v765_v60 = vadd.f32 %v764_v37, %v763_v54  ;;  %v773_v61 = vrot.slane %v772_v57, 1  ;;  %v781_v62 = vadd.f32 %v780_v58, %v779_v56  ;;  %890 = vmatpush.msrb.mxu1 %v282_v49  ;;  %946 = vmatpush.msra.mxu0 %v282_v49  ;;  %v277_v54 = vld [vmem:[#allocation13 + $0x50] sm:$0xff]  ;;  %v275_v37 = vld [vmem:[#allocation13 + $0x40] sm:$0xff] }
 0x485   :  { %921 = vmatpush.msrb.mxu2 %v287_v43  ;;  %977 = vmatpush.msra.mxu3 %v287_v43 }
 0x486   :  { %v759_v63 = vadd.f32 %v758_v59, %v757_v46  ;;  %v766_v0 = vrot.slane %v765_v60, 1  ;;  %v774_v1 = vadd.f32 %v773_v61, %v772_v57  ;;  %v782_v2 = vrot.slane %v781_v62, 1  ;;  %891 = vmatpush.msrb.mxu1 %v281_v50  ;;  %947 = vmatpush.msra.mxu0 %v281_v50 }
 0x487   :  { %922 = vmatpush.msrb.mxu2 %v286_v44  ;;  %978 = vmatpush.msra.mxu3 %v286_v44 }
 0x488   :  { %v767_v3 = vadd.f32 %v766_v0, %v765_v60  ;;  %v783_v4 = vadd.f32 %v782_v2, %v781_v62  ;;  %v775_v5 = vadd.f32 %v774_v1, %v759_v63  ;;  %892 = vmatpush.msrb.mxu1 %v280_v51  ;;  %948 = vmatpush.msra.mxu0 %v280_v51  ;;  %v274_v60 = vld [vmem:[#allocation13 + $0x38] sm:$0xff]  ;;  %v273_v63 = vld [vmem:[#allocation13 + $0x30] sm:$0xff]  ;;  %v272_v0 = vld [vmem:[#allocation13 + $0x28] sm:$0xff] }
 0x489   :  { %923 = vmatpush.msrb.mxu2 %v285_v45  ;;  %979 = vmatpush.msra.mxu3 %v285_v45 }
 0x48a   :  { %v784_v6 = vadd.f32 %v783_v4, %v767_v3  ;;  %893 = vmatpush.msrb.mxu1 %v279_v52  ;;  %949 = vmatpush.msra.mxu0 %v279_v52  ;;  %v271_v4 = vld [vmem:[#allocation13 + $0x20] sm:$0xff] }
 0x48b   :  { %924 = vmatpush.msrb.mxu2 %v284_v47  ;;  %980 = vmatpush.msra.mxu3 %v284_v47 }
 0x48c   :  { %v785_v7 = vsel %vm547_vm8, %v775_v5, %v784_v6  ;;  %894 = vmatpush.msrb.mxu1 %v278_v53  ;;  %950 = vmatpush.msra.mxu0 %v278_v53  ;;  %v270_v5 = vld [vmem:[#allocation13 + $0x18] sm:$0xff]  ;;  %v269_v6 = vld [vmem:[#allocation13 + $0x10] sm:$0xff] }
 0x48d   :  { %1000 = vmatmul.msk.f32.vlgmr.msrb.gmra.mxu3 %vm179_vm2, %v785_v7  ;;  %925 = vmatpush.msrb.mxu2 %v283_v48 }
 0x48e   :  { %981 = vmatpush.msra.mxu3 %v283_v48  ;;  %895 = vmatpush.msrb.mxu1 %v277_v54 }
 0x48f   :  { %951 = vmatpush.msra.mxu0 %v277_v54 }
 0x490   :  { %896 = vmatpush.msrb.mxu1 %v276_v55 }
 0x491   :  { %952 = vmatpush.msra.mxu0 %v276_v55 }
 0x492   :  { %897 = vmatpush.msrb.mxu1 %v275_v37 }
 0x493   :  { %953 = vmatpush.msra.mxu0 %v275_v37 }
 0x494   :  { %898 = vmatpush.msrb.mxu1 %v274_v60 }
 0x495   :  { %954 = vmatpush.msra.mxu0 %v274_v60 }
 0x496   :  { %899 = vmatpush.msrb.mxu1 %v273_v63 }
 0x497   :  { %955 = vmatpush.msra.mxu0 %v273_v63 }
 0x498   :  { %900 = vmatpush.msrb.mxu1 %v272_v0 }
 0x499   :  { %956 = vmatpush.msra.mxu0 %v272_v0 }
 0x49a   :  { %901 = vmatpush.msrb.mxu1 %v271_v4 }
 0x49b   :  { %957 = vmatpush.msra.mxu0 %v271_v4 }
 0x49c   :  { %902 = vmatpush.msrb.mxu1 %v270_v5 }
 0x49d   :  { %958 = vmatpush.msra.mxu0 %v270_v5 }
 0x49e   :  { %903 = vmatpush.msrb.mxu1 %v269_v6 }
 0x49f   :  { %959 = vmatpush.msra.mxu0 %v269_v6 }
 0x4a0   :  { %904 = vmatpush.msrb.mxu1 %v268_v16 }
 0x4a1   :  { %960 = vmatpush.msra.mxu0 %v268_v16 }
 0x510   :  { %v814_v17 = vpop.f32.mrf.mxu3 }
 0x511   :  { %v817_v19 = vmul.f32 0.125, %v814_v17  ;;  %v267_v17 = vld [vmem:[#allocation13] sm:$0xff] }
 0x512   :  { %905 = vmatpush.msrb.mxu1 %v267_v17  ;;  %961 = vmatpush.msra.mxu0 %v267_v17 }
 0x513   :  { %v818_v21 = vmul.f32 %v817_v19, %v817_v19 }
 0x515   :  { %v820_v23 = vrot.slane %v818_v21, 7 }
 0x517   :  { %v822_v25 = vsub.f32 %v817_v19, %v820_v23 }
 0x519   :  { %v823_v26 = vadd.f32 1e-05, %v822_v25 }
 0x51b   :  { %1050 = vrsqrt.f32 %v823_v26  ;;  %vm830_vm0 = vweird.f32 %v823_v26 }
 0x521   :  { %v1051_v27 = vpop.eup %1050 }
 0x522   :  { %v825_v28 = vmul.f32 %v1051_v27, %v823_v26  ;;  %vm831_vm15 = vweird.f32 %v1051_v27 }
 0x523   :  { %vm832_vm1 = vmor %vm830_vm0, %vm831_vm15 }
 0x524   :  { %v826_v29 = vmul.f32 %v1051_v27, %v825_v28 }
 0x526   :  { %v827_v30 = vmul.f32 0.5, %v826_v29 }
 0x528   :  { %v828_v31 = vsub.f32 1.5, %v827_v30 }
 0x52a   :  { %v829_v32 = vmul.f32 %v1051_v27, %v828_v31 }
 0x52c   :  { %v833_v33 = vsel %vm832_vm1, %v1051_v27, %v829_v32 }
 0x52d   :  { %v834_v34 = vsel %vm547_vm8, %v817_v19, %v833_v33  ;;  %v876_v19 = vld [vmem:[#allocation5] sm:$0x1] }
 0x52e   :  { %1001 = vmatmul.msk.f32.vlgmr.msrb.gmra.mxu0 %vm319_vm3, %v834_v34 }
 0x5ab   :  { %v859_v56 = vpop.f32.mrf.mxu0 }
 0x5ac   :  { %v862_v46 = vperm.slane %v859_v56, 0  ;;  %v864_v58 = vperm.slane %v859_v56, 1 }
 0x5ae   :  { %v863_v57 = vsub.f32 %v1465_v38, %v862_v46  ;;  %v866_v59 = vsub.f32 %v1467_v39, %v862_v46  ;;  %v1040_v39 = vpop.permute.xlu1 %1039 }
 0x5af   :  { %v1041_v7 = vunpack.i.l.bf16 %v1040_v39  ;;  %v1042_v8 = vunpack.i.h.bf16 %v1040_v39 }
 0x5b0   :  { %v865_v61 = vmul.f32 %v864_v58, %v863_v57  ;;  %v867_v62 = vmul.f32 %v866_v59, %v864_v58 }
 0x5b2   :  { %vm868_vm3 = vcmp.ge.f32.partialorder %v865_v61, 0.0  ;;  %v869_v1 = vmul.f32 0.2, %v865_v61  ;;  %vm872_vm4 = vcmp.ge.f32.partialorder %v867_v62, 0.0  ;;  %v873_v2 = vmul.f32 0.2, %v867_v62 }
 0x5b4   :  { %v870_v3 = vsel %vm868_vm3, %v865_v61, %v869_v1  ;;  %v874_v38 = vsel %vm872_vm4, %v867_v62, %v873_v2 }
 0x5b5   :  { %871 = vst.msk [vmem:[#allocation5 + $0x1] sm:$0x3] %vm752_vm14, %v870_v3 }
 0x5b6   :  { %875 = vst.msk [vmem:[#allocation5 + $0x5] sm:$0x3] %vm752_vm14, %v874_v38 }
 0x5bc   :  { %v878_v9 = vld [vmem:[#allocation5 + $0x2] sm:$0x1]  ;;  %v877_v10 = vld [vmem:[#allocation5 + $0x1] sm:$0x1] }
 0x5bd   :  { %v889_v11 = vsel %vm179_vm2, %v878_v9, %v1041_v7  ;;  %v934_v12 = vld [vmem:[#allocation5 + $0x6] sm:$0x1]  ;;  %v933_v13 = vld [vmem:[#allocation5 + $0x5] sm:$0x1] }
 0x5be   :  { %926 = vmatmul.f32.vlgmr.msrb.gmra.mxu2 %v889_v11  ;;  %v945_v14 = vsel %vm179_vm2, %v934_v12, %v1042_v8  ;;  %v1043_v15 = vpack.i.bf16 %v933_v13, %v877_v10 }
 0x5bf   :  { %982 = vmatmul.f32.vlgmr.msra.gmra.mxu3 %v945_v14 }
 0x5c0   :  { %1044 = vrot.lane.b32.xlu2 %v1043_v15, %s1293_s27 }
 0x61a   :  { %v1045_v18 = vpop.permute.xlu2 %1044 }
 0x61b   :  { %v1047_v21 = vunpack.i.h.bf16 %v1045_v18  ;;  %v1046_v22 = vunpack.i.l.bf16 %v1045_v18 }
 0x61d   :  { %v888_v23 = vsel %vm179_vm2, %v876_v19, %v1046_v22  ;;  %v944_v24 = vsel %vm179_vm2, %v932_v20, %v1047_v21 }
 0x61e   :  { %906 = vmatmul.f32.vlgmr.msrb.gmra.mxu1 %v888_v23  ;;  %962 = vmatmul.f32.vlgmr.msra.gmra.mxu0 %v944_v24 }
 0x641   :  { %v927_v25 = vpop.f32.mrf.mxu2 }
 0x642   :  { %v983_v26 = vpop.f32.mrf.mxu3 }
 0x69b   :  { %v907_v27 = vpop.f32.mrf.mxu1  ;;  %v963_v28 = vpop.f32.mrf.mxu0 }
 0x69c   :  { %v928_v29 = vadd.f32 %v927_v25, %v907_v27  ;;  %v984_v30 = vadd.f32 %v983_v26, %v963_v28 }
 0x69e   :  { %931 = vst.msk [vmem:[%s1508_s9] sm:$0x1] %vm930_vm5, %v928_v29 }
 0x69f   :  { %986 = vst.msk [vmem:[%s1508_s9 + $0x1] sm:$0x1] %vm930_vm5, %v984_v30 }
 0x6a0   :  { %991 = vsyncpa [#allocation7], 1 }
 0x6a1   :  { %992 = vsyncpa [#allocation9], 1 }
 0x6a2   :  { %993 = vsyncpa [#allocation12], 1 }
 0x6a3   :  { %994 = vsyncpa [#allocation15], 1 }
 0x6a4   :  { %995 = vsyncpa [#allocation18], 1 }

</bundles_post_ra>
